<compile_context>
chip_gen: v5e
topology: v5e:2x2
jax: 0.10.0
libtpu: 0.0.40
codegen_flags: <defaults>
</compile_context>

<pallas_src>
import math
import numpy as np
import jax
import jax.numpy as jnp
from jax.experimental import pallas as pl
from jax.experimental.pallas import tpu as pltpu


# ----------------------------------------------------------------------------
# Gaussian kernel (get_gaussian_kernel(sd=1.5) -> ksz=7, normalized, separable)
# ----------------------------------------------------------------------------
SD = 1.5
KSZ = int(4 * SD + 1)   # 7
RAD = KSZ // 2          # 3
BI = 5                  # crop border used inside match_colors (BI > RAD)


def _gauss_1d():
    k = np.arange(-(KSZ - 1) / 2.0, (KSZ + 1) / 2.0)
    g1 = np.exp(-1.0 / (2.0 * SD ** 2) * k ** 2) / (math.sqrt(2 * math.pi) * SD)
    # normalized so that outer(g, g) == the normalized 2-D gaussian kernel
    return (g1 / g1.sum()).astype(np.float32)


G1 = _gauss_1d()                                   # (7,)
GAUSS_W = np.outer(G1, G1).astype(np.float32)      # (7, 7), kept for API parity


# ----------------------------------------------------------------------------
# Blurred & cropped means: plain JAX (perf review: too small to amortize a
# pallas_call; XLA fuses blur + crop + Gram einsums under jit).
# ----------------------------------------------------------------------------
def _blurred_cropped_mean(x):
    """apply_kernel(x, 7, gauss)[:, :, BI:-BI, BI:-BI], pad-free.

    BI (5) > blur radius (3): every tap of every cropped output pixel is an
    interior pixel, so the conv padding of the original is numerically
    irrelevant and no padding is applied at all (perf review item 1)."""
    B, C, H, W = x.shape
    Hc, Wc = H - 2 * BI, W - 2 * BI
    off = BI - RAD                         # 2
    Hh = Hc + KSZ - 1                      # rows the vertical pass consumes
    # horizontal 7-tap pass (separable)
    h = float(G1[0]) * x[:, :, off:off + Hh, off:off + Wc]
    for j in range(1, KSZ):
        h = h + float(G1[j]) * x[:, :, off:off + Hh, off + j:off + j + Wc]
    # vertical 7-tap pass
    v = float(G1[0]) * h[:, :, 0:Hc, :]
    for i in range(1, KSZ):
        v = v + float(G1[i]) * h[:, :, i:i + Hc, :]
    return v                               # (B, C, Hc, Wc)


# ----------------------------------------------------------------------------
# Pallas kernel: per-batch 3x3 colour transform of the full-resolution image.
# ----------------------------------------------------------------------------
_LANE = 128
_SUB = 8
_MAX_ROW_BLOCK = 512        # (1, 3, 512, 128) f32 ≈ 0.75 MiB per buffer


def _apply_cmat_kernel(cT_ref, x_ref, o_ref):
    # cT_ref: (B*9,) f32 in SMEM (c_mat^T, row-major per batch)
    # x_ref / o_ref: (1, 3, R, 128) VMEM blocks (same HBM buffer: in-place)
    b = pl.program_id(0)
    base = b * 9
    # hoist the 9 scalar reads above the chunk loop (perf review)
    c00 = cT_ref[base + 0]; c01 = cT_ref[base + 1]; c02 = cT_ref[base + 2]
    c10 = cT_ref[base + 3]; c11 = cT_ref[base + 4]; c12 = cT_ref[base + 5]
    c20 = cT_ref[base + 6]; c21 = cT_ref[base + 7]; c22 = cT_ref[base + 8]

    R = x_ref.shape[2]                     # rows in this block (multiple of 8)
    CH = 16 if R % 16 == 0 else 8          # sublane chunk: keeps live vregs tiny

    def body(i, carry):
        r0 = pl.multiple_of(i * CH, CH)
        x0 = x_ref[0, 0, pl.ds(r0, CH), :]
        x1 = x_ref[0, 1, pl.ds(r0, CH), :]
        x2 = x_ref[0, 2, pl.ds(r0, CH), :]
        o_ref[0, 0, pl.ds(r0, CH), :] = (c00 * x0 + c01 * x1 + c02 * x2).astype(o_ref.dtype)
        o_ref[0, 1, pl.ds(r0, CH), :] = (c10 * x0 + c11 * x1 + c12 * x2).astype(o_ref.dtype)
        o_ref[0, 2, pl.ds(r0, CH), :] = (c20 * x0 + c21 * x1 + c22 * x2).astype(o_ref.dtype)
        return carry

    jax.lax.fori_loop(0, R // CH, body, 0, unroll=True)


def apply_cmat(im, c_mat_T):
    """out[b] = c_mat[b]^T @ im[b]   (im: (B, 3, H, W), c_mat_T: (B, 3, 3))."""
    B, C, H, W = im.shape
    N = H * W
    tile = _SUB * _LANE                        # 1024: full (8,128) tiles only
    N_pad = -(-N // tile) * tile
    x = im.reshape(B, C, N)
    if N_pad != N:
        x = jnp.pad(x, ((0, 0), (0, 0), (0, N_pad - N)))
    Nt = N_pad // _LANE                        # multiple of 8
    x = x.reshape(B, C, Nt, _LANE)

    # resolution-independent row tiling (bounded VMEM on v7x at any resolution)
    R = Nt if Nt <= _MAX_ROW_BLOCK else _MAX_ROW_BLOCK
    if Nt % R:
        extra = -(-Nt // R) * R - Nt
        x = jnp.pad(x, ((0, 0), (0, 0), (0, extra), (0, 0)))
        Nt += extra
    n_row_blocks = Nt // R

    cT_flat = c_mat_T.reshape(B * C * C).astype(jnp.float32)   # 1-D SMEM operand

    # TODO(synk): bf16 I/O would ~halve HBM traffic on v6e/v7x; kept f32 to
    #             preserve the module's dtype contract (and v5e has no bf16 VPU).
    out = pl.pallas_call(
        _apply_cmat_kernel,
        out_shape=jax.ShapeDtypeStruct((B, C, Nt, _LANE), im.dtype),
        grid=(B, n_row_blocks),
        in_specs=[pl.BlockSpec(memory_space=pltpu.MemorySpace.SMEM),
                  pl.BlockSpec((1, C, R, _LANE), lambda b, r: (b, 0, r, 0))],
        out_specs=pl.BlockSpec((1, C, R, _LANE), lambda b, r: (b, 0, r, 0)),
        input_output_aliases={1: 0},           # in-place: x is a temporary
        compiler_params=pltpu.CompilerParams(
            dimension_semantics=("parallel", "parallel")),
    )(cT_flat, x)
    return out.reshape(B, C, Nt * _LANE)[:, :, :N].reshape(B, C, H, W)


# ----------------------------------------------------------------------------
# JAX glue: bilinear flow-warp (grid_sample-like, zero padding)
# TODO(synk): the data-dependent gather of grid_sample stays in plain JAX; it
#             is not a clean fit for a rectangular-BlockSpec Pallas pipeline.
# ----------------------------------------------------------------------------
def warp(feat, flow):
    B, C, H, W = feat.shape
    ys, xs = jnp.meshgrid(jnp.arange(H, dtype=jnp.float32),
                          jnp.arange(W, dtype=jnp.float32), indexing='ij')
    x_s = xs[None] + flow[:, 0]
    y_s = ys[None] + flow[:, 1]
    x0 = jnp.floor(x_s)
    y0 = jnp.floor(y_s)
    wx1 = x_s - x0
    wy1 = y_s - y0
    wx0 = 1.0 - wx1
    wy0 = 1.0 - wy1
    flat = feat.reshape(B, C, H * W)

    def gather(yc, xc):
        inb = (xc >= 0) & (xc <= W - 1) & (yc >= 0) & (yc <= H - 1)
        xi = jnp.clip(xc, 0, W - 1).astype(jnp.int32)
        yi = jnp.clip(yc, 0, H - 1).astype(jnp.int32)
        idx = (yi * W + xi).reshape(B, 1, H * W)
        idx = jnp.broadcast_to(idx, (B, C, H * W))
        g = jnp.take_along_axis(flat, idx, axis=2).reshape(B, C, H, W)
        return g * inb[:, None].astype(feat.dtype)

    out = (wy0 * wx0)[:, None] * gather(y0, x0) \
        + (wy0 * wx1)[:, None] * gather(y0, x0 + 1) \
        + (wy1 * wx0)[:, None] * gather(y0 + 1, x0) \
        + (wy1 * wx1)[:, None] * gather(y0 + 1, x0 + 1)
    return out


def _resize_bilinear(x, out_hw):
    B, C = x.shape[0], x.shape[1]
    return jax.image.resize(x, (B, C, out_hw[0], out_hw[1]),
                            method='bilinear', antialias=False)


# ----------------------------------------------------------------------------
# match_colors
# ----------------------------------------------------------------------------
def match_colors(im_ref, im_q, im_test, ksz, gauss_kernel):
    del ksz, gauss_kernel   # blur weights are baked into the separable blur

    B = im_ref.shape[0]
    ref_mean = _blurred_cropped_mean(im_ref)           # (B, 3, 6, 6)
    q_mean = _blurred_cropped_mean(im_q)               # (B, 3, 6, 6)
    Hc, Wc = ref_mean.shape[-2], ref_mean.shape[-1]
    ref_re = ref_mean.reshape(B, 3, -1)
    q_re = q_mean.reshape(B, 3, -1)

    # batched 3x3 least squares via ridge-regularised normal equations
    # (ridge per correctness review: 36 samples can be ill-conditioned)
    AtA = jnp.einsum('bin,bjn->bij', q_re, q_re)       # (B, 3, 3)
    AtY = jnp.einsum('bin,bjn->bij', q_re, ref_re)     # (B, 3, 3)
    scale = jnp.trace(AtA, axis1=1, axis2=2)[:, None, None] / 3.0
    ridge = 1e-6 * scale + 1e-10
    c_mat = jnp.linalg.solve(AtA + ridge * jnp.eye(3, dtype=AtA.dtype), AtY)
    c_mat_T = jnp.transpose(c_mat, (0, 2, 1))

    # colour-transform + per-pixel error on the 36-px crop: plain JAX (tiny)
    q_conv = jnp.einsum('bij,bjn->bin', c_mat_T, q_re)
    d = (q_conv - ref_re) * 255.0
    err = jnp.sqrt(jnp.sum(d * d, axis=1)).reshape(B, Hc, Wc)
    valid = err < 20.0

    pad = (im_q.shape[-1] - valid.shape[-1]) // 2
    valid = jnp.pad(valid, ((0, 0), (pad, pad), (pad, pad)))
    upsample_factor = im_test.shape[-1] / valid.shape[-1]
    Hv = int(valid.shape[-2] * upsample_factor)
    Wv = int(valid.shape[-1] * upsample_factor)
    valid = _resize_bilinear(valid[:, None].astype(jnp.float32), (Hv, Wv))
    valid = valid > 0.9

    # full-resolution colour transform of im_test: the hot path -> Pallas
    im_t_conv = apply_cmat(im_test, c_mat_T)
    return im_t_conv, valid


# ----------------------------------------------------------------------------
# Stub alignment net (external module in the original code) — deterministic.
# ----------------------------------------------------------------------------
class StubAlignmentNet:
    def __init__(self, key):
        self.w = 0.5 * jax.random.normal(key, (2, 6), jnp.float32)

    def __call__(self, a, b):
        x = jnp.concatenate([a, b], axis=1)                 # (B, 6, H, W)
        flow = jnp.einsum('oc,bchw->bohw', self.w, x)
        return jnp.tanh(flow) * 2.0                         # small flow (pixels)


# ----------------------------------------------------------------------------
# SpatialColorAlignment
# ----------------------------------------------------------------------------
class SpatialColorAlignment:
    def __init__(self, alignment_net, sr_factor=4):
        self.sr_factor = sr_factor
        self.alignment_net = alignment_net
        self.gauss_kernel = jnp.asarray(GAUSS_W)[None]      # (1, 7, 7)
        self.ksz = KSZ

    def __call__(self, pred, gt, burst_input):
        flow = jax.lax.stop_gradient(
            self.alignment_net(pred / (pred.max() + 1e-6),
                               gt / (gt.max() + 1e-6)))
        pred_warped = warp(pred, flow)

        ds_factor = 1.0 / float(2.0 * self.sr_factor)
        Hd = int(flow.shape[-2] * ds_factor)
        Wd = int(flow.shape[-1] * ds_factor)
        flow_ds = _resize_bilinear(flow, (Hd, Wd)) * ds_factor

        burst_0 = burst_input[:, 0, jnp.array([0, 1, 3])]   # (B, 3, h, w)
        burst_0_warped = warp(burst_0, flow_ds)
        frame_gt_ds = _resize_bilinear(gt, (Hd, Wd))

        pred_warped_m, valid = match_colors(frame_gt_ds, burst_0_warped,
                                            pred_warped, self.ksz,
                                            self.gauss_kernel)
        return pred_warped_m, valid


# ----------------------------------------------------------------------------
if __name__ == "__main__":
    key = jax.random.PRNGKey(0)
    k1, k2, k3, k4 = jax.random.split(key, 4)

    B = 2
    sr_factor = 4
    H = W = 128                       # SR / prediction resolution
    lr = H // (2 * sr_factor)         # 16: burst / downsampled resolution

    pred = jax.random.uniform(k1, (B, 3, H, W), jnp.float32)
    gt = jax.random.uniform(k2, (B, 3, H, W), jnp.float32)
    burst_input = jax.random.uniform(k3, (B, 3, 4, lr, lr), jnp.float32)

    sca = SpatialColorAlignment(StubAlignmentNet(k4), sr_factor=sr_factor)
    fwd = jax.jit(lambda p, g, b: sca(p, g, b))   # jit so the JAX parts fuse
    pred_warped_m, valid = fwd(pred, gt, burst_input)
    jax.block_until_ready((pred_warped_m, valid))

    assert pred_warped_m.shape == (B, 3, H, W)
    assert valid.shape == (B, 1, H, W) and valid.dtype == jnp.bool_
    assert bool(jnp.all(jnp.isfinite(pred_warped_m)))
    print("KERNEL_OK")
</pallas_src>

<mosaic_0001>
module attributes {stable_mosaic.version = 11 : i64} {
  func.func @_apply_cmat_kernel(%arg0: i32, %arg1: i32, %arg2: memref<18xf32, #tpu.memory_space<smem>>, %arg3: memref<1x3x128x128xf32, #tpu.memory_space<vmem>>, %arg4: memref<1x3x128x128xf32, #tpu.memory_space<vmem>>) attributes {dimension_semantics = [#tpu.dimension_semantics<parallel>, #tpu.dimension_semantics<parallel>], iteration_bounds = array<i64: 2, 1>, scalar_prefetch = 0 : i64, scratch_operands = 0 : i64, tpu.core_type = #tpu.core_type<tc>, window_params = [{transform_indices = @transform_0, window_bounds = array<i64: 18>}, {transform_indices = @transform_1, window_bounds = array<i64: 1, 3, 128, 128>}, {transform_indices = @transform_2, window_bounds = array<i64: 1, 3, 128, 128>}]} {
    %c9_i32 = arith.constant 9 : i32
    %0 = arith.muli %arg0, %c9_i32 : i32
    %c0_i32 = arith.constant 0 : i32
    %1 = arith.addi %0, %c0_i32 : i32
    %2 = arith.index_cast %1 : i32 to index
    %3 = memref.load %arg2[%2] : memref<18xf32, #tpu.memory_space<smem>>
    %c1_i32 = arith.constant 1 : i32
    %4 = arith.addi %0, %c1_i32 : i32
    %5 = arith.index_cast %4 : i32 to index
    %6 = memref.load %arg2[%5] : memref<18xf32, #tpu.memory_space<smem>>
    %c2_i32 = arith.constant 2 : i32
    %7 = arith.addi %0, %c2_i32 : i32
    %8 = arith.index_cast %7 : i32 to index
    %9 = memref.load %arg2[%8] : memref<18xf32, #tpu.memory_space<smem>>
    %c3_i32 = arith.constant 3 : i32
    %10 = arith.addi %0, %c3_i32 : i32
    %11 = arith.index_cast %10 : i32 to index
    %12 = memref.load %arg2[%11] : memref<18xf32, #tpu.memory_space<smem>>
    %c4_i32 = arith.constant 4 : i32
    %13 = arith.addi %0, %c4_i32 : i32
    %14 = arith.index_cast %13 : i32 to index
    %15 = memref.load %arg2[%14] : memref<18xf32, #tpu.memory_space<smem>>
    %c5_i32 = arith.constant 5 : i32
    %16 = arith.addi %0, %c5_i32 : i32
    %17 = arith.index_cast %16 : i32 to index
    %18 = memref.load %arg2[%17] : memref<18xf32, #tpu.memory_space<smem>>
    %c6_i32 = arith.constant 6 : i32
    %19 = arith.addi %0, %c6_i32 : i32
    %20 = arith.index_cast %19 : i32 to index
    %21 = memref.load %arg2[%20] : memref<18xf32, #tpu.memory_space<smem>>
    %c7_i32 = arith.constant 7 : i32
    %22 = arith.addi %0, %c7_i32 : i32
    %23 = arith.index_cast %22 : i32 to index
    %24 = memref.load %arg2[%23] : memref<18xf32, #tpu.memory_space<smem>>
    %c8_i32 = arith.constant 8 : i32
    %25 = arith.addi %0, %c8_i32 : i32
    %26 = arith.index_cast %25 : i32 to index
    %27 = memref.load %arg2[%26] : memref<18xf32, #tpu.memory_space<smem>>
    %c0_i32_0 = arith.constant 0 : i32
    %c16_i32 = arith.constant 16 : i32
    %28 = arith.muli %c0_i32_0, %c16_i32 : i32
    %29 = tpu.assume_multiple %28, 16 : i32
    %c0 = arith.constant 0 : index
    %c0_1 = arith.constant 0 : index
    %30 = arith.index_cast %29 : i32 to index
    %c0_2 = arith.constant 0 : index
    %31 = vector.load %arg3[%c0, %c0_1, %30, %c0_2] : memref<1x3x128x128xf32, #tpu.memory_space<vmem>>, vector<1x1x16x128xf32>
    %32 = vector.shape_cast %31 : vector<1x1x16x128xf32> to vector<16x128xf32>
    %c0_3 = arith.constant 0 : index
    %c1 = arith.constant 1 : index
    %33 = arith.index_cast %29 : i32 to index
    %c0_4 = arith.constant 0 : index
    %34 = vector.load %arg3[%c0_3, %c1, %33, %c0_4] : memref<1x3x128x128xf32, #tpu.memory_space<vmem>>, vector<1x1x16x128xf32>
    %35 = vector.shape_cast %34 : vector<1x1x16x128xf32> to vector<16x128xf32>
    %c0_5 = arith.constant 0 : index
    %c2 = arith.constant 2 : index
    %36 = arith.index_cast %29 : i32 to index
    %c0_6 = arith.constant 0 : index
    %37 = vector.load %arg3[%c0_5, %c2, %36, %c0_6] : memref<1x3x128x128xf32, #tpu.memory_space<vmem>>, vector<1x1x16x128xf32>
    %38 = vector.shape_cast %37 : vector<1x1x16x128xf32> to vector<16x128xf32>
    %39 = vector.broadcast %3 : f32 to vector<16x128xf32>
    %40 = arith.mulf %39, %32 : vector<16x128xf32>
    %41 = vector.broadcast %6 : f32 to vector<16x128xf32>
    %42 = arith.mulf %41, %35 : vector<16x128xf32>
    %43 = arith.addf %40, %42 : vector<16x128xf32>
    %44 = vector.broadcast %9 : f32 to vector<16x128xf32>
    %45 = arith.mulf %44, %38 : vector<16x128xf32>
    %46 = arith.addf %43, %45 : vector<16x128xf32>
    %c0_7 = arith.constant 0 : index
    %c0_8 = arith.constant 0 : index
    %47 = arith.index_cast %29 : i32 to index
    %c0_9 = arith.constant 0 : index
    %48 = vector.load %arg4[%c0_7, %c0_8, %47, %c0_9] : memref<1x3x128x128xf32, #tpu.memory_space<vmem>>, vector<1x1x16x128xf32>
    %49 = vector.shape_cast %48 : vector<1x1x16x128xf32> to vector<16x128xf32>
    %50 = vector.shape_cast %46 : vector<16x128xf32> to vector<1x1x16x128xf32>
    tpu.vector_store %arg4[%c0_7, %c0_8, %47, %c0_9], %50 {strides = array<i32>} : memref<1x3x128x128xf32, #tpu.memory_space<vmem>>, vector<1x1x16x128xf32>,
    %51 = vector.broadcast %12 : f32 to vector<16x128xf32>
    %52 = arith.mulf %51, %32 : vector<16x128xf32>
    %53 = vector.broadcast %15 : f32 to vector<16x128xf32>
    %54 = arith.mulf %53, %35 : vector<16x128xf32>
    %55 = arith.addf %52, %54 : vector<16x128xf32>
    %56 = vector.broadcast %18 : f32 to vector<16x128xf32>
    %57 = arith.mulf %56, %38 : vector<16x128xf32>
    %58 = arith.addf %55, %57 : vector<16x128xf32>
    %c0_10 = arith.constant 0 : index
    %c1_11 = arith.constant 1 : index
    %59 = arith.index_cast %29 : i32 to index
    %c0_12 = arith.constant 0 : index
    %60 = vector.load %arg4[%c0_10, %c1_11, %59, %c0_12] : memref<1x3x128x128xf32, #tpu.memory_space<vmem>>, vector<1x1x16x128xf32>
    %61 = vector.shape_cast %60 : vector<1x1x16x128xf32> to vector<16x128xf32>
    %62 = vector.shape_cast %58 : vector<16x128xf32> to vector<1x1x16x128xf32>
    tpu.vector_store %arg4[%c0_10, %c1_11, %59, %c0_12], %62 {strides = array<i32>} : memref<1x3x128x128xf32, #tpu.memory_space<vmem>>, vector<1x1x16x128xf32>,
    %63 = vector.broadcast %21 : f32 to vector<16x128xf32>
    %64 = arith.mulf %63, %32 : vector<16x128xf32>
    %65 = vector.broadcast %24 : f32 to vector<16x128xf32>
    %66 = arith.mulf %65, %35 : vector<16x128xf32>
    %67 = arith.addf %64, %66 : vector<16x128xf32>
    %68 = vector.broadcast %27 : f32 to vector<16x128xf32>
    %69 = arith.mulf %68, %38 : vector<16x128xf32>
    %70 = arith.addf %67, %69 : vector<16x128xf32>
    %c0_13 = arith.constant 0 : index
    %c2_14 = arith.constant 2 : index
    %71 = arith.index_cast %29 : i32 to index
    %c0_15 = arith.constant 0 : index
    %72 = vector.load %arg4[%c0_13, %c2_14, %71, %c0_15] : memref<1x3x128x128xf32, #tpu.memory_space<vmem>>, vector<1x1x16x128xf32>
    %73 = vector.shape_cast %72 : vector<1x1x16x128xf32> to vector<16x128xf32>
    %74 = vector.shape_cast %70 : vector<16x128xf32> to vector<1x1x16x128xf32>
    tpu.vector_store %arg4[%c0_13, %c2_14, %71, %c0_15], %74 {strides = array<i32>} : memref<1x3x128x128xf32, #tpu.memory_space<vmem>>, vector<1x1x16x128xf32>,
    %c1_i32_16 = arith.constant 1 : i32
    %c16_i32_17 = arith.constant 16 : i32
    %75 = arith.muli %c1_i32_16, %c16_i32_17 : i32
    %76 = tpu.assume_multiple %75, 16 : i32
    %c0_18 = arith.constant 0 : index
    %c0_19 = arith.constant 0 : index
    %77 = arith.index_cast %76 : i32 to index
    %c0_20 = arith.constant 0 : index
    %78 = vector.load %arg3[%c0_18, %c0_19, %77, %c0_20] : memref<1x3x128x128xf32, #tpu.memory_space<vmem>>, vector<1x1x16x128xf32>
    %79 = vector.shape_cast %78 : vector<1x1x16x128xf32> to vector<16x128xf32>
    %c0_21 = arith.constant 0 : index
    %c1_22 = arith.constant 1 : index
    %80 = arith.index_cast %76 : i32 to index
    %c0_23 = arith.constant 0 : index
    %81 = vector.load %arg3[%c0_21, %c1_22, %80, %c0_23] : memref<1x3x128x128xf32, #tpu.memory_space<vmem>>, vector<1x1x16x128xf32>
    %82 = vector.shape_cast %81 : vector<1x1x16x128xf32> to vector<16x128xf32>
    %c0_24 = arith.constant 0 : index
    %c2_25 = arith.constant 2 : index
    %83 = arith.index_cast %76 : i32 to index
    %c0_26 = arith.constant 0 : index
    %84 = vector.load %arg3[%c0_24, %c2_25, %83, %c0_26] : memref<1x3x128x128xf32, #tpu.memory_space<vmem>>, vector<1x1x16x128xf32>
    %85 = vector.shape_cast %84 : vector<1x1x16x128xf32> to vector<16x128xf32>
    %86 = vector.broadcast %3 : f32 to vector<16x128xf32>
    %87 = arith.mulf %86, %79 : vector<16x128xf32>
    %88 = vector.broadcast %6 : f32 to vector<16x128xf32>
    %89 = arith.mulf %88, %82 : vector<16x128xf32>
    %90 = arith.addf %87, %89 : vector<16x128xf32>
    %91 = vector.broadcast %9 : f32 to vector<16x128xf32>
    %92 = arith.mulf %91, %85 : vector<16x128xf32>
    %93 = arith.addf %90, %92 : vector<16x128xf32>
    %c0_27 = arith.constant 0 : index
    %c0_28 = arith.constant 0 : index
    %94 = arith.index_cast %76 : i32 to index
    %c0_29 = arith.constant 0 : index
    %95 = vector.load %arg4[%c0_27, %c0_28, %94, %c0_29] : memref<1x3x128x128xf32, #tpu.memory_space<vmem>>, vector<1x1x16x128xf32>
    %96 = vector.shape_cast %95 : vector<1x1x16x128xf32> to vector<16x128xf32>
    %97 = vector.shape_cast %93 : vector<16x128xf32> to vector<1x1x16x128xf32>
    tpu.vector_store %arg4[%c0_27, %c0_28, %94, %c0_29], %97 {strides = array<i32>} : memref<1x3x128x128xf32, #tpu.memory_space<vmem>>, vector<1x1x16x128xf32>,
    %98 = vector.broadcast %12 : f32 to vector<16x128xf32>
    %99 = arith.mulf %98, %79 : vector<16x128xf32>
    %100 = vector.broadcast %15 : f32 to vector<16x128xf32>
    %101 = arith.mulf %100, %82 : vector<16x128xf32>
    %102 = arith.addf %99, %101 : vector<16x128xf32>
    %103 = vector.broadcast %18 : f32 to vector<16x128xf32>
    %104 = arith.mulf %103, %85 : vector<16x128xf32>
    %105 = arith.addf %102, %104 : vector<16x128xf32>
    %c0_30 = arith.constant 0 : index
    %c1_31 = arith.constant 1 : index
    %106 = arith.index_cast %76 : i32 to index
    %c0_32 = arith.constant 0 : index
    %107 = vector.load %arg4[%c0_30, %c1_31, %106, %c0_32] : memref<1x3x128x128xf32, #tpu.memory_space<vmem>>, vector<1x1x16x128xf32>
    %108 = vector.shape_cast %107 : vector<1x1x16x128xf32> to vector<16x128xf32>
    %109 = vector.shape_cast %105 : vector<16x128xf32> to vector<1x1x16x128xf32>
    tpu.vector_store %arg4[%c0_30, %c1_31, %106, %c0_32], %109 {strides = array<i32>} : memref<1x3x128x128xf32, #tpu.memory_space<vmem>>, vector<1x1x16x128xf32>,
    %110 = vector.broadcast %21 : f32 to vector<16x128xf32>
    %111 = arith.mulf %110, %79 : vector<16x128xf32>
    %112 = vector.broadcast %24 : f32 to vector<16x128xf32>
    %113 = arith.mulf %112, %82 : vector<16x128xf32>
    %114 = arith.addf %111, %113 : vector<16x128xf32>
    %115 = vector.broadcast %27 : f32 to vector<16x128xf32>
    %116 = arith.mulf %115, %85 : vector<16x128xf32>
    %117 = arith.addf %114, %116 : vector<16x128xf32>
    %c0_33 = arith.constant 0 : index
    %c2_34 = arith.constant 2 : index
    %118 = arith.index_cast %76 : i32 to index
    %c0_35 = arith.constant 0 : index
    %119 = vector.load %arg4[%c0_33, %c2_34, %118, %c0_35] : memref<1x3x128x128xf32, #tpu.memory_space<vmem>>, vector<1x1x16x128xf32>
    %120 = vector.shape_cast %119 : vector<1x1x16x128xf32> to vector<16x128xf32>
    %121 = vector.shape_cast %117 : vector<16x128xf32> to vector<1x1x16x128xf32>
    tpu.vector_store %arg4[%c0_33, %c2_34, %118, %c0_35], %121 {strides = array<i32>} : memref<1x3x128x128xf32, #tpu.memory_space<vmem>>, vector<1x1x16x128xf32>,
    %c2_i32_36 = arith.constant 2 : i32
    %c16_i32_37 = arith.constant 16 : i32
    %122 = arith.muli %c2_i32_36, %c16_i32_37 : i32
    %123 = tpu.assume_multiple %122, 16 : i32
    %c0_38 = arith.constant 0 : index
    %c0_39 = arith.constant 0 : index
    %124 = arith.index_cast %123 : i32 to index
    %c0_40 = arith.constant 0 : index
    %125 = vector.load %arg3[%c0_38, %c0_39, %124, %c0_40] : memref<1x3x128x128xf32, #tpu.memory_space<vmem>>, vector<1x1x16x128xf32>
    %126 = vector.shape_cast %125 : vector<1x1x16x128xf32> to vector<16x128xf32>
    %c0_41 = arith.constant 0 : index
    %c1_42 = arith.constant 1 : index
    %127 = arith.index_cast %123 : i32 to index
    %c0_43 = arith.constant 0 : index
    %128 = vector.load %arg3[%c0_41, %c1_42, %127, %c0_43] : memref<1x3x128x128xf32, #tpu.memory_space<vmem>>, vector<1x1x16x128xf32>
    %129 = vector.shape_cast %128 : vector<1x1x16x128xf32> to vector<16x128xf32>
    %c0_44 = arith.constant 0 : index
    %c2_45 = arith.constant 2 : index
    %130 = arith.index_cast %123 : i32 to index
    %c0_46 = arith.constant 0 : index
    %131 = vector.load %arg3[%c0_44, %c2_45, %130, %c0_46] : memref<1x3x128x128xf32, #tpu.memory_space<vmem>>, vector<1x1x16x128xf32>
    %132 = vector.shape_cast %131 : vector<1x1x16x128xf32> to vector<16x128xf32>
    %133 = vector.broadcast %3 : f32 to vector<16x128xf32>
    %134 = arith.mulf %133, %126 : vector<16x128xf32>
    %135 = vector.broadcast %6 : f32 to vector<16x128xf32>
    %136 = arith.mulf %135, %129 : vector<16x128xf32>
    %137 = arith.addf %134, %136 : vector<16x128xf32>
    %138 = vector.broadcast %9 : f32 to vector<16x128xf32>
    %139 = arith.mulf %138, %132 : vector<16x128xf32>
    %140 = arith.addf %137, %139 : vector<16x128xf32>
    %c0_47 = arith.constant 0 : index
    %c0_48 = arith.constant 0 : index
    %141 = arith.index_cast %123 : i32 to index
    %c0_49 = arith.constant 0 : index
    %142 = vector.load %arg4[%c0_47, %c0_48, %141, %c0_49] : memref<1x3x128x128xf32, #tpu.memory_space<vmem>>, vector<1x1x16x128xf32>
    %143 = vector.shape_cast %142 : vector<1x1x16x128xf32> to vector<16x128xf32>
    %144 = vector.shape_cast %140 : vector<16x128xf32> to vector<1x1x16x128xf32>
    tpu.vector_store %arg4[%c0_47, %c0_48, %141, %c0_49], %144 {strides = array<i32>} : memref<1x3x128x128xf32, #tpu.memory_space<vmem>>, vector<1x1x16x128xf32>,
    %145 = vector.broadcast %12 : f32 to vector<16x128xf32>
    %146 = arith.mulf %145, %126 : vector<16x128xf32>
    %147 = vector.broadcast %15 : f32 to vector<16x128xf32>
    %148 = arith.mulf %147, %129 : vector<16x128xf32>
    %149 = arith.addf %146, %148 : vector<16x128xf32>
    %150 = vector.broadcast %18 : f32 to vector<16x128xf32>
    %151 = arith.mulf %150, %132 : vector<16x128xf32>
    %152 = arith.addf %149, %151 : vector<16x128xf32>
    %c0_50 = arith.constant 0 : index
    %c1_51 = arith.constant 1 : index
    %153 = arith.index_cast %123 : i32 to index
    %c0_52 = arith.constant 0 : index
    %154 = vector.load %arg4[%c0_50, %c1_51, %153, %c0_52] : memref<1x3x128x128xf32, #tpu.memory_space<vmem>>, vector<1x1x16x128xf32>
    %155 = vector.shape_cast %154 : vector<1x1x16x128xf32> to vector<16x128xf32>
    %156 = vector.shape_cast %152 : vector<16x128xf32> to vector<1x1x16x128xf32>
    tpu.vector_store %arg4[%c0_50, %c1_51, %153, %c0_52], %156 {strides = array<i32>} : memref<1x3x128x128xf32, #tpu.memory_space<vmem>>, vector<1x1x16x128xf32>,
    %157 = vector.broadcast %21 : f32 to vector<16x128xf32>
    %158 = arith.mulf %157, %126 : vector<16x128xf32>
    %159 = vector.broadcast %24 : f32 to vector<16x128xf32>
    %160 = arith.mulf %159, %129 : vector<16x128xf32>
    %161 = arith.addf %158, %160 : vector<16x128xf32>
    %162 = vector.broadcast %27 : f32 to vector<16x128xf32>
    %163 = arith.mulf %162, %132 : vector<16x128xf32>
    %164 = arith.addf %161, %163 : vector<16x128xf32>
    %c0_53 = arith.constant 0 : index
    %c2_54 = arith.constant 2 : index
    %165 = arith.index_cast %123 : i32 to index
    %c0_55 = arith.constant 0 : index
    %166 = vector.load %arg4[%c0_53, %c2_54, %165, %c0_55] : memref<1x3x128x128xf32, #tpu.memory_space<vmem>>, vector<1x1x16x128xf32>
    %167 = vector.shape_cast %166 : vector<1x1x16x128xf32> to vector<16x128xf32>
    %168 = vector.shape_cast %164 : vector<16x128xf32> to vector<1x1x16x128xf32>
    tpu.vector_store %arg4[%c0_53, %c2_54, %165, %c0_55], %168 {strides = array<i32>} : memref<1x3x128x128xf32, #tpu.memory_space<vmem>>, vector<1x1x16x128xf32>,
    %c3_i32_56 = arith.constant 3 : i32
    %c16_i32_57 = arith.constant 16 : i32
    %169 = arith.muli %c3_i32_56, %c16_i32_57 : i32
    %170 = tpu.assume_multiple %169, 16 : i32
    %c0_58 = arith.constant 0 : index
    %c0_59 = arith.constant 0 : index
    %171 = arith.index_cast %170 : i32 to index
    %c0_60 = arith.constant 0 : index
    %172 = vector.load %arg3[%c0_58, %c0_59, %171, %c0_60] : memref<1x3x128x128xf32, #tpu.memory_space<vmem>>, vector<1x1x16x128xf32>
    %173 = vector.shape_cast %172 : vector<1x1x16x128xf32> to vector<16x128xf32>
    %c0_61 = arith.constant 0 : index
    %c1_62 = arith.constant 1 : index
    %174 = arith.index_cast %170 : i32 to index
    %c0_63 = arith.constant 0 : index
    %175 = vector.load %arg3[%c0_61, %c1_62, %174, %c0_63] : memref<1x3x128x128xf32, #tpu.memory_space<vmem>>, vector<1x1x16x128xf32>
    %176 = vector.shape_cast %175 : vector<1x1x16x128xf32> to vector<16x128xf32>
    %c0_64 = arith.constant 0 : index
    %c2_65 = arith.constant 2 : index
    %177 = arith.index_cast %170 : i32 to index
    %c0_66 = arith.constant 0 : index
    %178 = vector.load %arg3[%c0_64, %c2_65, %177, %c0_66] : memref<1x3x128x128xf32, #tpu.memory_space<vmem>>, vector<1x1x16x128xf32>
    %179 = vector.shape_cast %178 : vector<1x1x16x128xf32> to vector<16x128xf32>
    %180 = vector.broadcast %3 : f32 to vector<16x128xf32>
    %181 = arith.mulf %180, %173 : vector<16x128xf32>
    %182 = vector.broadcast %6 : f32 to vector<16x128xf32>
    %183 = arith.mulf %182, %176 : vector<16x128xf32>
    %184 = arith.addf %181, %183 : vector<16x128xf32>
    %185 = vector.broadcast %9 : f32 to vector<16x128xf32>
    %186 = arith.mulf %185, %179 : vector<16x128xf32>
    %187 = arith.addf %184, %186 : vector<16x128xf32>
    %c0_67 = arith.constant 0 : index
    %c0_68 = arith.constant 0 : index
    %188 = arith.index_cast %170 : i32 to index
    %c0_69 = arith.constant 0 : index
    %189 = vector.load %arg4[%c0_67, %c0_68, %188, %c0_69] : memref<1x3x128x128xf32, #tpu.memory_space<vmem>>, vector<1x1x16x128xf32>
    %190 = vector.shape_cast %189 : vector<1x1x16x128xf32> to vector<16x128xf32>
    %191 = vector.shape_cast %187 : vector<16x128xf32> to vector<1x1x16x128xf32>
    tpu.vector_store %arg4[%c0_67, %c0_68, %188, %c0_69], %191 {strides = array<i32>} : memref<1x3x128x128xf32, #tpu.memory_space<vmem>>, vector<1x1x16x128xf32>,
    %192 = vector.broadcast %12 : f32 to vector<16x128xf32>
    %193 = arith.mulf %192, %173 : vector<16x128xf32>
    %194 = vector.broadcast %15 : f32 to vector<16x128xf32>
    %195 = arith.mulf %194, %176 : vector<16x128xf32>
    %196 = arith.addf %193, %195 : vector<16x128xf32>
    %197 = vector.broadcast %18 : f32 to vector<16x128xf32>
    %198 = arith.mulf %197, %179 : vector<16x128xf32>
    %199 = arith.addf %196, %198 : vector<16x128xf32>
    %c0_70 = arith.constant 0 : index
    %c1_71 = arith.constant 1 : index
    %200 = arith.index_cast %170 : i32 to index
    %c0_72 = arith.constant 0 : index
    %201 = vector.load %arg4[%c0_70, %c1_71, %200, %c0_72] : memref<1x3x128x128xf32, #tpu.memory_space<vmem>>, vector<1x1x16x128xf32>
    %202 = vector.shape_cast %201 : vector<1x1x16x128xf32> to vector<16x128xf32>
    %203 = vector.shape_cast %199 : vector<16x128xf32> to vector<1x1x16x128xf32>
    tpu.vector_store %arg4[%c0_70, %c1_71, %200, %c0_72], %203 {strides = array<i32>} : memref<1x3x128x128xf32, #tpu.memory_space<vmem>>, vector<1x1x16x128xf32>,
    %204 = vector.broadcast %21 : f32 to vector<16x128xf32>
    %205 = arith.mulf %204, %173 : vector<16x128xf32>
    %206 = vector.broadcast %24 : f32 to vector<16x128xf32>
    %207 = arith.mulf %206, %176 : vector<16x128xf32>
    %208 = arith.addf %205, %207 : vector<16x128xf32>
    %209 = vector.broadcast %27 : f32 to vector<16x128xf32>
    %210 = arith.mulf %209, %179 : vector<16x128xf32>
    %211 = arith.addf %208, %210 : vector<16x128xf32>
    %c0_73 = arith.constant 0 : index
    %c2_74 = arith.constant 2 : index
    %212 = arith.index_cast %170 : i32 to index
    %c0_75 = arith.constant 0 : index
    %213 = vector.load %arg4[%c0_73, %c2_74, %212, %c0_75] : memref<1x3x128x128xf32, #tpu.memory_space<vmem>>, vector<1x1x16x128xf32>
    %214 = vector.shape_cast %213 : vector<1x1x16x128xf32> to vector<16x128xf32>
    %215 = vector.shape_cast %211 : vector<16x128xf32> to vector<1x1x16x128xf32>
    tpu.vector_store %arg4[%c0_73, %c2_74, %212, %c0_75], %215 {strides = array<i32>} : memref<1x3x128x128xf32, #tpu.memory_space<vmem>>, vector<1x1x16x128xf32>,
    %c4_i32_76 = arith.constant 4 : i32
    %c16_i32_77 = arith.constant 16 : i32
    %216 = arith.muli %c4_i32_76, %c16_i32_77 : i32
    %217 = tpu.assume_multiple %216, 16 : i32
    %c0_78 = arith.constant 0 : index
    %c0_79 = arith.constant 0 : index
    %218 = arith.index_cast %217 : i32 to index
    %c0_80 = arith.constant 0 : index
    %219 = vector.load %arg3[%c0_78, %c0_79, %218, %c0_80] : memref<1x3x128x128xf32, #tpu.memory_space<vmem>>, vector<1x1x16x128xf32>
    %220 = vector.shape_cast %219 : vector<1x1x16x128xf32> to vector<16x128xf32>
    %c0_81 = arith.constant 0 : index
    %c1_82 = arith.constant 1 : index
    %221 = arith.index_cast %217 : i32 to index
    %c0_83 = arith.constant 0 : index
    %222 = vector.load %arg3[%c0_81, %c1_82, %221, %c0_83] : memref<1x3x128x128xf32, #tpu.memory_space<vmem>>, vector<1x1x16x128xf32>
    %223 = vector.shape_cast %222 : vector<1x1x16x128xf32> to vector<16x128xf32>
    %c0_84 = arith.constant 0 : index
    %c2_85 = arith.constant 2 : index
    %224 = arith.index_cast %217 : i32 to index
    %c0_86 = arith.constant 0 : index
    %225 = vector.load %arg3[%c0_84, %c2_85, %224, %c0_86] : memref<1x3x128x128xf32, #tpu.memory_space<vmem>>, vector<1x1x16x128xf32>
    %226 = vector.shape_cast %225 : vector<1x1x16x128xf32> to vector<16x128xf32>
    %227 = vector.broadcast %3 : f32 to vector<16x128xf32>
    %228 = arith.mulf %227, %220 : vector<16x128xf32>
    %229 = vector.broadcast %6 : f32 to vector<16x128xf32>
    %230 = arith.mulf %229, %223 : vector<16x128xf32>
    %231 = arith.addf %228, %230 : vector<16x128xf32>
    %232 = vector.broadcast %9 : f32 to vector<16x128xf32>
    %233 = arith.mulf %232, %226 : vector<16x128xf32>
    %234 = arith.addf %231, %233 : vector<16x128xf32>
    %c0_87 = arith.constant 0 : index
    %c0_88 = arith.constant 0 : index
    %235 = arith.index_cast %217 : i32 to index
    %c0_89 = arith.constant 0 : index
    %236 = vector.load %arg4[%c0_87, %c0_88, %235, %c0_89] : memref<1x3x128x128xf32, #tpu.memory_space<vmem>>, vector<1x1x16x128xf32>
    %237 = vector.shape_cast %236 : vector<1x1x16x128xf32> to vector<16x128xf32>
    %238 = vector.shape_cast %234 : vector<16x128xf32> to vector<1x1x16x128xf32>
    tpu.vector_store %arg4[%c0_87, %c0_88, %235, %c0_89], %238 {strides = array<i32>} : memref<1x3x128x128xf32, #tpu.memory_space<vmem>>, vector<1x1x16x128xf32>,
    %239 = vector.broadcast %12 : f32 to vector<16x128xf32>
    %240 = arith.mulf %239, %220 : vector<16x128xf32>
    %241 = vector.broadcast %15 : f32 to vector<16x128xf32>
    %242 = arith.mulf %241, %223 : vector<16x128xf32>
    %243 = arith.addf %240, %242 : vector<16x128xf32>
    %244 = vector.broadcast %18 : f32 to vector<16x128xf32>
    %245 = arith.mulf %244, %226 : vector<16x128xf32>
    %246 = arith.addf %243, %245 : vector<16x128xf32>
    %c0_90 = arith.constant 0 : index
    %c1_91 = arith.constant 1 : index
    %247 = arith.index_cast %217 : i32 to index
    %c0_92 = arith.constant 0 : index
    %248 = vector.load %arg4[%c0_90, %c1_91, %247, %c0_92] : memref<1x3x128x128xf32, #tpu.memory_space<vmem>>, vector<1x1x16x128xf32>
    %249 = vector.shape_cast %248 : vector<1x1x16x128xf32> to vector<16x128xf32>
    %250 = vector.shape_cast %246 : vector<16x128xf32> to vector<1x1x16x128xf32>
    tpu.vector_store %arg4[%c0_90, %c1_91, %247, %c0_92], %250 {strides = array<i32>} : memref<1x3x128x128xf32, #tpu.memory_space<vmem>>, vector<1x1x16x128xf32>,
    %251 = vector.broadcast %21 : f32 to vector<16x128xf32>
    %252 = arith.mulf %251, %220 : vector<16x128xf32>
    %253 = vector.broadcast %24 : f32 to vector<16x128xf32>
    %254 = arith.mulf %253, %223 : vector<16x128xf32>
    %255 = arith.addf %252, %254 : vector<16x128xf32>
    %256 = vector.broadcast %27 : f32 to vector<16x128xf32>
    %257 = arith.mulf %256, %226 : vector<16x128xf32>
    %258 = arith.addf %255, %257 : vector<16x128xf32>
    %c0_93 = arith.constant 0 : index
    %c2_94 = arith.constant 2 : index
    %259 = arith.index_cast %217 : i32 to index
    %c0_95 = arith.constant 0 : index
    %260 = vector.load %arg4[%c0_93, %c2_94, %259, %c0_95] : memref<1x3x128x128xf32, #tpu.memory_space<vmem>>, vector<1x1x16x128xf32>
    %261 = vector.shape_cast %260 : vector<1x1x16x128xf32> to vector<16x128xf32>
    %262 = vector.shape_cast %258 : vector<16x128xf32> to vector<1x1x16x128xf32>
    tpu.vector_store %arg4[%c0_93, %c2_94, %259, %c0_95], %262 {strides = array<i32>} : memref<1x3x128x128xf32, #tpu.memory_space<vmem>>, vector<1x1x16x128xf32>,
    %c5_i32_96 = arith.constant 5 : i32
    %c16_i32_97 = arith.constant 16 : i32
    %263 = arith.muli %c5_i32_96, %c16_i32_97 : i32
    %264 = tpu.assume_multiple %263, 16 : i32
    %c0_98 = arith.constant 0 : index
    %c0_99 = arith.constant 0 : index
    %265 = arith.index_cast %264 : i32 to index
    %c0_100 = arith.constant 0 : index
    %266 = vector.load %arg3[%c0_98, %c0_99, %265, %c0_100] : memref<1x3x128x128xf32, #tpu.memory_space<vmem>>, vector<1x1x16x128xf32>
    %267 = vector.shape_cast %266 : vector<1x1x16x128xf32> to vector<16x128xf32>
    %c0_101 = arith.constant 0 : index
    %c1_102 = arith.constant 1 : index
    %268 = arith.index_cast %264 : i32 to index
    %c0_103 = arith.constant 0 : index
    %269 = vector.load %arg3[%c0_101, %c1_102, %268, %c0_103] : memref<1x3x128x128xf32, #tpu.memory_space<vmem>>, vector<1x1x16x128xf32>
    %270 = vector.shape_cast %269 : vector<1x1x16x128xf32> to vector<16x128xf32>
    %c0_104 = arith.constant 0 : index
    %c2_105 = arith.constant 2 : index
    %271 = arith.index_cast %264 : i32 to index
    %c0_106 = arith.constant 0 : index
    %272 = vector.load %arg3[%c0_104, %c2_105, %271, %c0_106] : memref<1x3x128x128xf32, #tpu.memory_space<vmem>>, vector<1x1x16x128xf32>
    %273 = vector.shape_cast %272 : vector<1x1x16x128xf32> to vector<16x128xf32>
    %274 = vector.broadcast %3 : f32 to vector<16x128xf32>
    %275 = arith.mulf %274, %267 : vector<16x128xf32>
    %276 = vector.broadcast %6 : f32 to vector<16x128xf32>
    %277 = arith.mulf %276, %270 : vector<16x128xf32>
    %278 = arith.addf %275, %277 : vector<16x128xf32>
    %279 = vector.broadcast %9 : f32 to vector<16x128xf32>
    %280 = arith.mulf %279, %273 : vector<16x128xf32>
    %281 = arith.addf %278, %280 : vector<16x128xf32>
    %c0_107 = arith.constant 0 : index
    %c0_108 = arith.constant 0 : index
    %282 = arith.index_cast %264 : i32 to index
    %c0_109 = arith.constant 0 : index
    %283 = vector.load %arg4[%c0_107, %c0_108, %282, %c0_109] : memref<1x3x128x128xf32, #tpu.memory_space<vmem>>, vector<1x1x16x128xf32>
    %284 = vector.shape_cast %283 : vector<1x1x16x128xf32> to vector<16x128xf32>
    %285 = vector.shape_cast %281 : vector<16x128xf32> to vector<1x1x16x128xf32>
    tpu.vector_store %arg4[%c0_107, %c0_108, %282, %c0_109], %285 {strides = array<i32>} : memref<1x3x128x128xf32, #tpu.memory_space<vmem>>, vector<1x1x16x128xf32>,
    %286 = vector.broadcast %12 : f32 to vector<16x128xf32>
    %287 = arith.mulf %286, %267 : vector<16x128xf32>
    %288 = vector.broadcast %15 : f32 to vector<16x128xf32>
    %289 = arith.mulf %288, %270 : vector<16x128xf32>
    %290 = arith.addf %287, %289 : vector<16x128xf32>
    %291 = vector.broadcast %18 : f32 to vector<16x128xf32>
    %292 = arith.mulf %291, %273 : vector<16x128xf32>
    %293 = arith.addf %290, %292 : vector<16x128xf32>
    %c0_110 = arith.constant 0 : index
    %c1_111 = arith.constant 1 : index
    %294 = arith.index_cast %264 : i32 to index
    %c0_112 = arith.constant 0 : index
    %295 = vector.load %arg4[%c0_110, %c1_111, %294, %c0_112] : memref<1x3x128x128xf32, #tpu.memory_space<vmem>>, vector<1x1x16x128xf32>
    %296 = vector.shape_cast %295 : vector<1x1x16x128xf32> to vector<16x128xf32>
    %297 = vector.shape_cast %293 : vector<16x128xf32> to vector<1x1x16x128xf32>
    tpu.vector_store %arg4[%c0_110, %c1_111, %294, %c0_112], %297 {strides = array<i32>} : memref<1x3x128x128xf32, #tpu.memory_space<vmem>>, vector<1x1x16x128xf32>,
    %298 = vector.broadcast %21 : f32 to vector<16x128xf32>
    %299 = arith.mulf %298, %267 : vector<16x128xf32>
    %300 = vector.broadcast %24 : f32 to vector<16x128xf32>
    %301 = arith.mulf %300, %270 : vector<16x128xf32>
    %302 = arith.addf %299, %301 : vector<16x128xf32>
    %303 = vector.broadcast %27 : f32 to vector<16x128xf32>
    %304 = arith.mulf %303, %273 : vector<16x128xf32>
    %305 = arith.addf %302, %304 : vector<16x128xf32>
    %c0_113 = arith.constant 0 : index
    %c2_114 = arith.constant 2 : index
    %306 = arith.index_cast %264 : i32 to index
    %c0_115 = arith.constant 0 : index
    %307 = vector.load %arg4[%c0_113, %c2_114, %306, %c0_115] : memref<1x3x128x128xf32, #tpu.memory_space<vmem>>, vector<1x1x16x128xf32>
    %308 = vector.shape_cast %307 : vector<1x1x16x128xf32> to vector<16x128xf32>
    %309 = vector.shape_cast %305 : vector<16x128xf32> to vector<1x1x16x128xf32>
    tpu.vector_store %arg4[%c0_113, %c2_114, %306, %c0_115], %309 {strides = array<i32>} : memref<1x3x128x128xf32, #tpu.memory_space<vmem>>, vector<1x1x16x128xf32>,
    %c6_i32_116 = arith.constant 6 : i32
    %c16_i32_117 = arith.constant 16 : i32
    %310 = arith.muli %c6_i32_116, %c16_i32_117 : i32
    %311 = tpu.assume_multiple %310, 16 : i32
    %c0_118 = arith.constant 0 : index
    %c0_119 = arith.constant 0 : index
    %312 = arith.index_cast %311 : i32 to index
    %c0_120 = arith.constant 0 : index
    %313 = vector.load %arg3[%c0_118, %c0_119, %312, %c0_120] : memref<1x3x128x128xf32, #tpu.memory_space<vmem>>, vector<1x1x16x128xf32>
    %314 = vector.shape_cast %313 : vector<1x1x16x128xf32> to vector<16x128xf32>
    %c0_121 = arith.constant 0 : index
    %c1_122 = arith.constant 1 : index
    %315 = arith.index_cast %311 : i32 to index
    %c0_123 = arith.constant 0 : index
    %316 = vector.load %arg3[%c0_121, %c1_122, %315, %c0_123] : memref<1x3x128x128xf32, #tpu.memory_space<vmem>>, vector<1x1x16x128xf32>
    %317 = vector.shape_cast %316 : vector<1x1x16x128xf32> to vector<16x128xf32>
    %c0_124 = arith.constant 0 : index
    %c2_125 = arith.constant 2 : index
    %318 = arith.index_cast %311 : i32 to index
    %c0_126 = arith.constant 0 : index
    %319 = vector.load %arg3[%c0_124, %c2_125, %318, %c0_126] : memref<1x3x128x128xf32, #tpu.memory_space<vmem>>, vector<1x1x16x128xf32>
    %320 = vector.shape_cast %319 : vector<1x1x16x128xf32> to vector<16x128xf32>
    %321 = vector.broadcast %3 : f32 to vector<16x128xf32>
    %322 = arith.mulf %321, %314 : vector<16x128xf32>
    %323 = vector.broadcast %6 : f32 to vector<16x128xf32>
    %324 = arith.mulf %323, %317 : vector<16x128xf32>
    %325 = arith.addf %322, %324 : vector<16x128xf32>
    %326 = vector.broadcast %9 : f32 to vector<16x128xf32>
    %327 = arith.mulf %326, %320 : vector<16x128xf32>
    %328 = arith.addf %325, %327 : vector<16x128xf32>
    %c0_127 = arith.constant 0 : index
    %c0_128 = arith.constant 0 : index
    %329 = arith.index_cast %311 : i32 to index
    %c0_129 = arith.constant 0 : index
    %330 = vector.load %arg4[%c0_127, %c0_128, %329, %c0_129] : memref<1x3x128x128xf32, #tpu.memory_space<vmem>>, vector<1x1x16x128xf32>
    %331 = vector.shape_cast %330 : vector<1x1x16x128xf32> to vector<16x128xf32>
    %332 = vector.shape_cast %328 : vector<16x128xf32> to vector<1x1x16x128xf32>
    tpu.vector_store %arg4[%c0_127, %c0_128, %329, %c0_129], %332 {strides = array<i32>} : memref<1x3x128x128xf32, #tpu.memory_space<vmem>>, vector<1x1x16x128xf32>,
    %333 = vector.broadcast %12 : f32 to vector<16x128xf32>
    %334 = arith.mulf %333, %314 : vector<16x128xf32>
    %335 = vector.broadcast %15 : f32 to vector<16x128xf32>
    %336 = arith.mulf %335, %317 : vector<16x128xf32>
    %337 = arith.addf %334, %336 : vector<16x128xf32>
    %338 = vector.broadcast %18 : f32 to vector<16x128xf32>
    %339 = arith.mulf %338, %320 : vector<16x128xf32>
    %340 = arith.addf %337, %339 : vector<16x128xf32>
    %c0_130 = arith.constant 0 : index
    %c1_131 = arith.constant 1 : index
    %341 = arith.index_cast %311 : i32 to index
    %c0_132 = arith.constant 0 : index
    %342 = vector.load %arg4[%c0_130, %c1_131, %341, %c0_132] : memref<1x3x128x128xf32, #tpu.memory_space<vmem>>, vector<1x1x16x128xf32>
    %343 = vector.shape_cast %342 : vector<1x1x16x128xf32> to vector<16x128xf32>
    %344 = vector.shape_cast %340 : vector<16x128xf32> to vector<1x1x16x128xf32>
    tpu.vector_store %arg4[%c0_130, %c1_131, %341, %c0_132], %344 {strides = array<i32>} : memref<1x3x128x128xf32, #tpu.memory_space<vmem>>, vector<1x1x16x128xf32>,
    %345 = vector.broadcast %21 : f32 to vector<16x128xf32>
    %346 = arith.mulf %345, %314 : vector<16x128xf32>
    %347 = vector.broadcast %24 : f32 to vector<16x128xf32>
    %348 = arith.mulf %347, %317 : vector<16x128xf32>
    %349 = arith.addf %346, %348 : vector<16x128xf32>
    %350 = vector.broadcast %27 : f32 to vector<16x128xf32>
    %351 = arith.mulf %350, %320 : vector<16x128xf32>
    %352 = arith.addf %349, %351 : vector<16x128xf32>
    %c0_133 = arith.constant 0 : index
    %c2_134 = arith.constant 2 : index
    %353 = arith.index_cast %311 : i32 to index
    %c0_135 = arith.constant 0 : index
    %354 = vector.load %arg4[%c0_133, %c2_134, %353, %c0_135] : memref<1x3x128x128xf32, #tpu.memory_space<vmem>>, vector<1x1x16x128xf32>
    %355 = vector.shape_cast %354 : vector<1x1x16x128xf32> to vector<16x128xf32>
    %356 = vector.shape_cast %352 : vector<16x128xf32> to vector<1x1x16x128xf32>
    tpu.vector_store %arg4[%c0_133, %c2_134, %353, %c0_135], %356 {strides = array<i32>} : memref<1x3x128x128xf32, #tpu.memory_space<vmem>>, vector<1x1x16x128xf32>,
    %c7_i32_136 = arith.constant 7 : i32
    %c16_i32_137 = arith.constant 16 : i32
    %357 = arith.muli %c7_i32_136, %c16_i32_137 : i32
    %358 = tpu.assume_multiple %357, 16 : i32
    %c0_138 = arith.constant 0 : index
    %c0_139 = arith.constant 0 : index
    %359 = arith.index_cast %358 : i32 to index
    %c0_140 = arith.constant 0 : index
    %360 = vector.load %arg3[%c0_138, %c0_139, %359, %c0_140] : memref<1x3x128x128xf32, #tpu.memory_space<vmem>>, vector<1x1x16x128xf32>
    %361 = vector.shape_cast %360 : vector<1x1x16x128xf32> to vector<16x128xf32>
    %c0_141 = arith.constant 0 : index
    %c1_142 = arith.constant 1 : index
    %362 = arith.index_cast %358 : i32 to index
    %c0_143 = arith.constant 0 : index
    %363 = vector.load %arg3[%c0_141, %c1_142, %362, %c0_143] : memref<1x3x128x128xf32, #tpu.memory_space<vmem>>, vector<1x1x16x128xf32>
    %364 = vector.shape_cast %363 : vector<1x1x16x128xf32> to vector<16x128xf32>
    %c0_144 = arith.constant 0 : index
    %c2_145 = arith.constant 2 : index
    %365 = arith.index_cast %358 : i32 to index
    %c0_146 = arith.constant 0 : index
    %366 = vector.load %arg3[%c0_144, %c2_145, %365, %c0_146] : memref<1x3x128x128xf32, #tpu.memory_space<vmem>>, vector<1x1x16x128xf32>
    %367 = vector.shape_cast %366 : vector<1x1x16x128xf32> to vector<16x128xf32>
    %368 = vector.broadcast %3 : f32 to vector<16x128xf32>
    %369 = arith.mulf %368, %361 : vector<16x128xf32>
    %370 = vector.broadcast %6 : f32 to vector<16x128xf32>
    %371 = arith.mulf %370, %364 : vector<16x128xf32>
    %372 = arith.addf %369, %371 : vector<16x128xf32>
    %373 = vector.broadcast %9 : f32 to vector<16x128xf32>
    %374 = arith.mulf %373, %367 : vector<16x128xf32>
    %375 = arith.addf %372, %374 : vector<16x128xf32>
    %c0_147 = arith.constant 0 : index
    %c0_148 = arith.constant 0 : index
    %376 = arith.index_cast %358 : i32 to index
    %c0_149 = arith.constant 0 : index
    %377 = vector.load %arg4[%c0_147, %c0_148, %376, %c0_149] : memref<1x3x128x128xf32, #tpu.memory_space<vmem>>, vector<1x1x16x128xf32>
    %378 = vector.shape_cast %377 : vector<1x1x16x128xf32> to vector<16x128xf32>
    %379 = vector.shape_cast %375 : vector<16x128xf32> to vector<1x1x16x128xf32>
    tpu.vector_store %arg4[%c0_147, %c0_148, %376, %c0_149], %379 {strides = array<i32>} : memref<1x3x128x128xf32, #tpu.memory_space<vmem>>, vector<1x1x16x128xf32>,
    %380 = vector.broadcast %12 : f32 to vector<16x128xf32>
    %381 = arith.mulf %380, %361 : vector<16x128xf32>
    %382 = vector.broadcast %15 : f32 to vector<16x128xf32>
    %383 = arith.mulf %382, %364 : vector<16x128xf32>
    %384 = arith.addf %381, %383 : vector<16x128xf32>
    %385 = vector.broadcast %18 : f32 to vector<16x128xf32>
    %386 = arith.mulf %385, %367 : vector<16x128xf32>
    %387 = arith.addf %384, %386 : vector<16x128xf32>
    %c0_150 = arith.constant 0 : index
    %c1_151 = arith.constant 1 : index
    %388 = arith.index_cast %358 : i32 to index
    %c0_152 = arith.constant 0 : index
    %389 = vector.load %arg4[%c0_150, %c1_151, %388, %c0_152] : memref<1x3x128x128xf32, #tpu.memory_space<vmem>>, vector<1x1x16x128xf32>
    %390 = vector.shape_cast %389 : vector<1x1x16x128xf32> to vector<16x128xf32>
    %391 = vector.shape_cast %387 : vector<16x128xf32> to vector<1x1x16x128xf32>
    tpu.vector_store %arg4[%c0_150, %c1_151, %388, %c0_152], %391 {strides = array<i32>} : memref<1x3x128x128xf32, #tpu.memory_space<vmem>>, vector<1x1x16x128xf32>,
    %392 = vector.broadcast %21 : f32 to vector<16x128xf32>
    %393 = arith.mulf %392, %361 : vector<16x128xf32>
    %394 = vector.broadcast %24 : f32 to vector<16x128xf32>
    %395 = arith.mulf %394, %364 : vector<16x128xf32>
    %396 = arith.addf %393, %395 : vector<16x128xf32>
    %397 = vector.broadcast %27 : f32 to vector<16x128xf32>
    %398 = arith.mulf %397, %367 : vector<16x128xf32>
    %399 = arith.addf %396, %398 : vector<16x128xf32>
    %c0_153 = arith.constant 0 : index
    %c2_154 = arith.constant 2 : index
    %400 = arith.index_cast %358 : i32 to index
    %c0_155 = arith.constant 0 : index
    %401 = vector.load %arg4[%c0_153, %c2_154, %400, %c0_155] : memref<1x3x128x128xf32, #tpu.memory_space<vmem>>, vector<1x1x16x128xf32>
    %402 = vector.shape_cast %401 : vector<1x1x16x128xf32> to vector<16x128xf32>
    %403 = vector.shape_cast %399 : vector<16x128xf32> to vector<1x1x16x128xf32>
    tpu.vector_store %arg4[%c0_153, %c2_154, %400, %c0_155], %403 {strides = array<i32>} : memref<1x3x128x128xf32, #tpu.memory_space<vmem>>, vector<1x1x16x128xf32>,
    %c8_i32_156 = arith.constant 8 : i32
    return
  }
  func.func @transform_0(%arg0: i32, %arg1: i32) -> i32 {
    %c0_i32 = arith.constant 0 : i32
    %c0_i32_0 = arith.constant 0 : i32
    return %c0_i32 : i32
  }
  func.func @transform_1(%arg0: i32, %arg1: i32) -> (i32, i32, i32, i32) {
    %c0_i32 = arith.constant 0 : i32
    %c0_i32_0 = arith.constant 0 : i32
    %c0_i32_1 = arith.constant 0 : i32
    return %arg0, %c0_i32, %arg1, %c0_i32_0 : i32, i32, i32, i32
  }
  func.func @transform_2(%arg0: i32, %arg1: i32) -> (i32, i32, i32, i32) {
    %c0_i32 = arith.constant 0 : i32
    %c0_i32_0 = arith.constant 0 : i32
    %c0_i32_1 = arith.constant 0 : i32
    return %arg0, %c0_i32, %arg1, %c0_i32_0 : i32, i32, i32, i32
  }
}

</mosaic_0001>

<bundles_post_ra>
// kernel: custom-call.8
= control target key start
LH: loop header
LB: loop body
LE: loop exit
PB: predicated region body
PF: predicated region fallthrough
CT: control target
= control target key end

     0   :  { %5 = vsyncpa [#allocation6], 0  ;;  %s911_s0 = inlined_call_operand.vmem [shape: f32[2,3,3], index: 0, kind: input, shape index: {}]   ;;  %s912_s1 = inlined_call_operand.vmem [shape: f32[2,3,3], index: 1, kind: output, shape index: {0}]   ;;  %s913_s2 = inlined_call_operand.hbm [shape: s32[2,3], index: 2, kind: output, shape index: {1}]   ;;  %s914_s3 = inlined_call_operand.vmem [shape: s32[2,3], index: 3, kind: output, shape index: {2}]  }
   0x1   :  { %7 = vsyncpa [#allocation6 + $0x1], 0  ;;  %s735_s12 = smov 0   ;;  %s737_s13 = smov 0  }
   0x2   :  { %s739_s14 = smov 0   ;;  %s741_s15 = smov 0  }
   0x3 LB: > { %s756_s16 = sadd.s32 4294967295, %s708_s15   ;;  %s571_s17 = sadd.s32 4294967294, %s708_s15   ;;  %s708_s15 = sphi %s741_s15, %s920_s15   ;;  %s704_s14 = sphi %s739_s14, %s919_s14   ;;  %s700_s13 = sphi %s737_s13, %s918_s13   ;;  %s696_s12 = sphi %s735_s12, %s917_s12  }
   0x4   : > { %s760_s18 = sadd.s32 1, %s708_s15   ;;  %s17_s19 = sshrl.u32 %s708_s15, 3 }
   0x5   : > { %s18_s20 = sshrl.u32 %s760_s18, 3  ;;  %s22_s21 = sadd.s32 1, %s704_s14 }
   0x6   : > { %s19_s22 = ssub.s32 %s17_s19, %s18_s20  ;;  %p32_p0 = scmp.ne.s32.totalorder %s704_s14, %s700_s13 }
   0x7   : > { %p20_p1 = scmp.eq.s32.totalorder %s19_s22, 0  ;;  %p33_p2 = scmp.eq.s32.totalorder %s756_s16, 1 }
   0x8   : > { %p38_p3 = scmp.ne.s32.totalorder %s700_s13, %s696_s12  ;;  %p39_p4 = scmp.eq.s32.totalorder %s571_s17, 1 }
   0x9   : > { %s771_s23 = scalar_select %p20_p1, %s704_s14, %s22_s21  }
   0xa   : > { %p773_p5 = por %p33_p2, %p32_p0  ;;  %p777_p6 = por %p39_p4, %p38_p3 }
   0xb   : > { %p573_p7 = scmp.ge.s32.totalorder %s708_s15, 2 }
   0xc   : > { %s85_s26 = sand.u32 (!%p573_p7), 1, %s708_s15   ;;  %s575_s27 = sshll.u32 (!%p573_p7), %s708_s15, 2 }
   0xd   : > { %83 = sbr.rel (%p573_p7) target bundleno = 20 (0x14), region = 16  ;;  %s574_s28 = sshll.u32 (!%p573_p7), %s85_s26, 2 }
   0xe   : > { %s89_s4 = scalar_lea.vmem (!%p573_p7), %s911_s0, %s575_s27  ;;  %s87_s5 = scalar_lea.vmem (!%p573_p7), [#allocation1], %s574_s28 }
  0x12   : > { %v106_v0 = vld [vmem:[%s89_s4] sm:$0xf] }
  0x13   : > { %107 = vst [vmem:[%s87_s5] sm:$0xf] %v106_v0 }
  0x14 PF: > { %p576_p8 = scmp.ge.s32.totalorder %s708_s15, 1  ;;  %p124_p9 = scmp.lt.s32.totalorder %s708_s15, 3 }
  0x16   : > { %p125_p10 = pnand %p576_p8, %p124_p9 }
  0x18   : > { %128 = sbr.rel (%p125_p10) target bundleno = 484 (0x1e4), region = 50 }
  0x1d   : > { %s135_s6 = sand.u32 1, %s756_s16   ;;  %s146_s7 = sand.u32 1, %s700_s13   ;;  %v168_v1 = vlaneseq  ;;  %v714_v4 = vmov 0  }
  0x1e   : > { %s793_s8 = sshll.u32 %s135_s6, 2  ;;  %s797_s9 = sshll.u32 %s146_s7, 1 }
  0x1f   : > { %v800_v2 = vshrl.u32 %v168_v1, 7  ;;  %s137_s10 = scalar_lea.vmem [#allocation1], %s793_s8  ;;  %s163_s11 = sand.u32 7, %s756_s16  }
  0x20   : > { %v157_v3 = vld [vmem:[%s137_s10] sm:$0xf]  ;;  %s805_s17 = scalar_lea.vmem [#allocation4], %s163_s11  ;;  %s141_s19 = scalar_lea.vmem [#allocation3], %s793_s8 }
  0x21   : > { %158 = vst [vmem:[#allocation0] sm:$0xf] %v157_v3  ;;  %s148_s20 = scalar_lea.vmem [#allocation5], %s797_s9  ;;  %s154_s21 = scalar_lea.vmem [#allocation8], %s797_s9 }
  0x22   : > { %172 = vst [vmem:[#allocation9] sm:$0xff] %v800_v2  ;;  %s811_s22 = scalar_lea.vmem [#allocation7], %s163_s11  ;;  %s813_s26 = smov 0  }
  0x23   : > { %167 = vst [vmem:[%s805_s17] sm:$0x1] %v714_v4 }
  0x28   : > { %v161_v5 = vld [vmem:[#allocation0] sm:$0xff] }
  0x29   : > { %162 = vst [vmem:[#allocation2] sm:$0xff] %v161_v5 }
  0x2a LB: >> { %vm188_vm0 = vcmp.lt.s32.totalorder %v800_v2, 3  ;;  %v820_v8 = vstv %s712_s26  ;;  %s229_s27 = ssub.s32 128, %s712_s26  ;;  %v235_v39 = vand.u32 127, %v168_v1  ;;  %s241_s28 = scalar_lea.vmem [#allocation2], %s712_s26  ;;  %v238_v42 = vld [vmem:[%s805_s17] ss:$0 sm:$0xff]  ;;  %s712_s26 = sphi %s813_s26, %s178_s26  }
  0x2b   : >> { %vm187_vm1 = vcmp.ge.s32.totalorder %v800_v2, %v820_v8  ;;  %s247_s4 = scalar_lea.vmem [#allocation9], %s712_s26  ;;  %vm267_vm14 = vcmp.gt.s32.totalorder %v800_v2, %v820_v8  ;;  %s178_s26 = sadd.s32 1, %s712_s26  }
  0x2c   : >> { %vm189_vm3 = vmand %vm187_vm1, %vm188_vm0  ;;  %vm236_vm12 = vcmp.eq.s32.totalorder %v235_v39, %v820_v8  ;;  %v249_v44 = vld [vmem:[%s247_s4] ss:$0 sm:$0xff]  ;;  %p175_p11 = scmp.ge.s32.totalorder %s178_s26, 3  }
  0x2d   : > { %s409_s6 = sshrl.u32 (%p175_p11), %s756_s16, 3  ;;  %s415_s26 = sshll.u32 (%p175_p11), %s148_s20, 4  ;;  %s416_s26 = int_to_ptr.vmem [resolvable:$true] %s415_s26 }
  0x2e   : > { %s852_s10 = sshll.u32 (%p175_p11), %s409_s6, 1  ;;  %s363_s6 = scalar_lea.sflag (%p175_p11), [#allocation6], %s146_s7 }
  0x30   : >> { %v183_v6 = vld [vmem:[#allocation2] sm:$0xff]  ;;  %v243_v40 = vld [vmem:[%s241_s28] ss:$0 sm:$0xff] }
  0x31   : >> { %v184_v7 = vand.u32 2147483647, %v183_v6 }
  0x33   : >> { %vm581_vm2 = vcmp.gt.f32.partialorder %v184_v7, -inf }
  0x34   : >> { %vm191_vm4 = vmand %vm189_vm3, %vm581_vm2 }
  0x35   : >> { %v192_v9 = vsel %vm191_vm4, %v800_v2, %v820_v8  ;;  %v193_v10 = vsel %vm191_vm4, %v184_v7, -inf  ;;  %vm284_vm4 = vmand %vm267_vm14, %vm236_vm12 }
  0x36   : >> { %v194_v11 = vrot.slane %v193_v10, 1  ;;  %v195_v12 = vrot.slane %v192_v9, 1 }
  0x38   : >> { %vm196_vm5 = vcmp.ge.f32.partialorder %v194_v11, %v193_v10  ;;  %v199_v13 = vrot.slane %v194_v11, 1  ;;  %v200_v14 = vrot.slane %v195_v12, 1 }
  0x39   : >> { %v197_v15 = vsel %vm196_vm5, %v194_v11, %v193_v10  ;;  %v198_v16 = vsel %vm196_vm5, %v195_v12, %v192_v9  ;;  %vm259_vm5 = vcmp.gt.s32.totalorder %v235_v39, %v820_v8 }
  0x3a   : >> { %vm201_vm6 = vcmp.ge.f32.partialorder %v199_v13, %v197_v15  ;;  %v204_v17 = vrot.slane %v199_v13, 1  ;;  %v205_v18 = vrot.slane %v200_v14, 1 }
  0x3b   : >> { %v202_v19 = vsel %vm201_vm6, %v199_v13, %v197_v15  ;;  %v203_v20 = vsel %vm201_vm6, %v200_v14, %v198_v16 }
  0x3c   : >> { %vm206_vm7 = vcmp.ge.f32.partialorder %v204_v17, %v202_v19  ;;  %v209_v21 = vrot.slane %v204_v17, 1  ;;  %v210_v22 = vrot.slane %v205_v18, 1 }
  0x3d   : >> { %v207_v23 = vsel %vm206_vm7, %v204_v17, %v202_v19  ;;  %v208_v24 = vsel %vm206_vm7, %v205_v18, %v203_v20 }
  0x3e   : >> { %vm211_vm8 = vcmp.ge.f32.partialorder %v209_v21, %v207_v23  ;;  %v214_v25 = vrot.slane %v209_v21, 1  ;;  %v215_v26 = vrot.slane %v210_v22, 1 }
  0x3f   : >> { %v212_v27 = vsel %vm211_vm8, %v209_v21, %v207_v23  ;;  %v213_v28 = vsel %vm211_vm8, %v210_v22, %v208_v24 }
  0x40   : >> { %vm216_vm9 = vcmp.ge.f32.partialorder %v214_v25, %v212_v27  ;;  %v219_v29 = vrot.slane %v214_v25, 1  ;;  %v220_v30 = vrot.slane %v215_v26, 1 }
  0x41   : >> { %v217_v31 = vsel %vm216_vm9, %v214_v25, %v212_v27  ;;  %v218_v32 = vsel %vm216_vm9, %v215_v26, %v213_v28 }
  0x42   : >> { %vm221_vm10 = vcmp.ge.f32.partialorder %v219_v29, %v217_v31  ;;  %v224_v33 = vrot.slane %v219_v29, 1  ;;  %v225_v34 = vrot.slane %v220_v30, 1 }
  0x43   : >> { %v222_v35 = vsel %vm221_vm10, %v219_v29, %v217_v31  ;;  %v223_v36 = vsel %vm221_vm10, %v220_v30, %v218_v32 }
  0x44   : >> { %vm226_vm11 = vcmp.ge.f32.partialorder %v224_v33, %v222_v35 }
  0x45   : >> { %v228_v37 = vsel %vm226_vm11, %v225_v34, %v223_v36 }
  0x46   : >> { %230 = vrot.lane.b32.xlu0 %v228_v37, %s229_s27 }
  0xb8   : >> { %v231_v38 = vpop.permute.xlu0 %230 }
  0xb9   : >> { %590 = vpush %v231_v38 }
  0xea   : >> { %s591_s29 = spop %590 }
  0xeb   : >> { %v237_v41 = vstv %s591_s29  ;;  %s242_s30 = scalar_lea.vmem [#allocation2], %s591_s29  ;;  %s248_s5 = scalar_lea.vmem [#allocation9], %s591_s29 }
  0xec   : >> { %v244_v43 = vld [vmem:[%s242_s30] ss:$0 sm:$0xff]  ;;  %v239_v46 = vsel %vm236_vm12, %v237_v41, %v238_v42 }
  0xed   : >> { %v250_v45 = vld [vmem:[%s248_s5] ss:$0 sm:$0xff]  ;;  %245 = vst [vmem:[%s242_s30] sm:$0x1] %v243_v40  ;;  %vm253_vm13 = vcmp.ne.f32.partialorder %v244_v43, 0.0  ;;  %v260_v62 = vsel %vm259_vm5, %v244_v43, 0.0 }
  0xee   : >> { %246 = vst [vmem:[%s241_s28] sm:$0x1] %v244_v43  ;;  %vm254_vm15 = vmand %vm236_vm12, %vm253_vm13  ;;  %s413_s28 = scalar_lea.hbm (%p175_p11), %s913_s2, %s852_s10 }
  0xef   : >> { %251 = vst [vmem:[%s248_s5] sm:$0x1] %v249_v44  ;;  %v255_v47 = vsel %vm254_vm15, %v244_v43, 1.0  ;;  %s417_s29 = sshll.u32 (%p175_p11), %s413_s28, 4  ;;  %s418_s29 = int_to_ptr.hbm [resolvable:$true] %s417_s29 }
  0xf0   : >> { %252 = vst [vmem:[%s247_s4] sm:$0x1] %v250_v45  ;;  %v268_v48 = vsel %vm267_vm14, %v255_v47, 1.0  ;;  %s656_s11 = sshra.s32 (%p175_p11), %s418_s29, 4  ;;  %s657_s11 = int_to_ptr.hbm [resolvable:$true] %s656_s11 }
  0xf1   : >> { %640 = vrcp.f32 %v268_v48  ;;  %240 = vst [vmem:[%s805_s17] sm:$0x1] %v239_v46  ;;  %v280_v52 = vand.u32 2147483648, %v268_v48  ;;  %v278_v54 = vand.u32 2147483647, %v268_v48  ;;  %vm274_vm1 = vweird.f32 %v268_v48  ;;  %s585_s17 = sshll.u32 (%p175_p11), %s756_s16, 2  ;;  %s658_s16 = scalar_lea.hbm (%p175_p11), %s657_s11, 2 }
  0xf2   : > { %s372_s5 = scalar_lea.vmem (%p175_p11), %s912_s1, %s585_s17  ;;  %p659_p12 = scmp.ne.s32.totalorder (%p175_p11), %s657_s11, %s658_s16 }
  0xf3   : >> { %v281_v56 = vor.u32 1.1754944e-38, %v280_v52  ;;  %vm279_vm3 = vcmp.eq.f32.partialorder %v278_v54, 8.507059e+37  ;;  %s662_s17 = scalar_lea.hbm (%p175_p11), %s913_s2, 2  ;;  %p663_p1 = scmp.lt.s32.totalorder (%p175_p11), %s657_s11, %s913_s2 }
  0xf4   : > { %p660_p13 = pnand (%p175_p11), %p659_p12, %p773_p5  ;;  %p664_p2 = scmp.lt.s32.totalorder (%p175_p11), %s662_s17, %s658_s16 }
  0xf5   : >> { %v264_v58 = vld [vmem:[#allocation2] sm:$0xff] }
  0xf6   : > { %p661_p0 = pneg (%p175_p11), %p660_p13  ;;  %p665_p3 = por (%p175_p11), %p664_p2, %p663_p1 }
  0xf7   : >> { %v641_v49 = vpop.eup %640  ;;  %v291_v4 = vld [vmem:[#allocation9] sm:$0xff] (%p175_p11) }
  0xf8   : >> { %v270_v50 = vmul.f32 %v641_v49, %v268_v48  ;;  %vm275_vm0 = vweird.f32 %v641_v49  ;;  %v348_v1 = vld [vmem:[#allocation4] sm:$0x3] (%p175_p11)  ;;  %p666_p4 = pnand (%p175_p11), %p665_p3, %p661_p0 }
  0xf9   : >> { %vm276_vm2 = vmor %vm274_vm1, %vm275_vm0  ;;  %351 = vst [vmem:[%s148_s20] sm:$0x3] (%p175_p11), %v348_v1 }
  0xfa   : >> { %v271_v51 = vsub.f32 1.0, %v270_v50 }
  0xfc   : >> { %v272_v53 = vmul.f32 %v641_v49, %v271_v51 }
  0xfe   : >> { %v273_v55 = vadd.f32 %v641_v49, %v272_v53 }
 0x100   : >> { %v277_v57 = vsel %vm276_vm2, %v641_v49, %v273_v55 }
 0x101   : >> { %v282_v59 = vsel %vm279_vm3, %v281_v56, %v277_v57 }
 0x102   : >> { %v283_v60 = vmul.f32 %v282_v59, %v264_v58 }
 0x104   : >> { %v285_v61 = vsel %vm284_vm4, %v283_v60, 0.0 }
 0x105   : >> { %286 = vadd.xlane.f32.xlu0 %v285_v61 }
 0x12e   : > { %307 = vxpose.xlu0.b32.start.end [1/1] (short) (narrow) (%p175_p11), %v291_v4, 8 }
 0x178   : >> { %v287_v63 = vpop.xlane.xlu0 %286 }
 0x179   : >> { %v288_v0 = vmul.f32 %v287_v63, %v260_v62  ;;  %177 = sbr.rel (!%p175_p11) target bundleno = 42 (0x2a), region = 202 }
 0x17b   : >> { %v289_v3 = vsub.f32 %v283_v60, %v288_v0 }
 0x17d   : >> { %290 = vst [vmem:[#allocation2] sm:$0xff] %v289_v3 }
 0x184   : > { %v342_v5 = vld [vmem:[#allocation2] sm:$0xf] }
 0x185   : > { %345 = vst [vmem:[%s141_s19] sm:$0xf] %v342_v5 }
 0x18c   : > { %v389_v2 = vld [vmem:[%s141_s19] sm:$0xf] }
 0x18d   : > { %390 = vst [vmem:[%s372_s5] sm:$0xf] %v389_v2 }
 0x18e   : > { %669 = shalt.err (!%p666_p4)
}
 0x18f   : > { %592 = dma.vmem_to_hbm [thread:$0]  (%p773_p5), %s416_s26, 32, %s418_s29, %s363_s6  }
 0x190   : > { %s426_s19 = scalar_lea.vmem (%p773_p5), %s914_s3, %s852_s10 }
 0x1d2   : > { %v323_v6 = vpop.trf.xlu0 }
 0x1d3   : > { %339 = vst [vmem:[%s811_s22] sm:$0x1] %v323_v6 }
 0x1d7   : > { %423 = sbr.rel (!%p773_p5) target bundleno = 484 (0x1e4), region = 96 }
 0x1da   : > { %v354_v7 = vld [vmem:[#allocation7] sm:$0x3] }
 0x1db   : > { %357 = vst [vmem:[%s154_s21] sm:$0x3] %v354_v7 }
 0x1e2   : > { %v443_v8 = vld [vmem:[%s154_s21] sm:$0x3] }
 0x1e3   : > { %444 = vst [vmem:[%s426_s19] sm:$0x3] %v443_v8 }
 0x1e4 PF: > { %s472_s20 = sand.u32 1, %s696_s12   ;;  %p595_p8 = pnand %p573_p7, %p777_p6 }
 0x1e5   : > { %s473_s24 = scalar_lea.sflag [#allocation6], %s472_s20 }
 0x1e6   : > { %p596_p9 = pneg %p595_p8 }
 0x1e8   : > { %691 = dma.done.wait (%p596_p9), %s473_s24, 32  }
 0x1e9   : > { %693 = vsyncadd (%p596_p9), %s473_s24, 4294967264  ;;  %p10_p5 = scmp.ge.s32.totalorder %s760_s18, 4   ;;  %s917_s12 = smov %s700_s13 }
 0x1ea   : > { %s918_s13 = smov %s704_s14  ;;  %s919_s14 = smov %s771_s23 }
 0x1eb   : > { %s920_s15 = smov %s760_s18  ;;  %12 = sbr.rel (!%p10_p5) target bundleno = 3 (0x3), region = 213 }
 0x1f0   :  { %486 = vsyncpa [#allocation6], 1 }
 0x1f1   :  { %488 = vsyncpa [#allocation6 + $0x1], 1 }

// kernel: custom-call.10
= control target key start
LH: loop header
LB: loop body
LE: loop exit
PB: predicated region body
PF: predicated region fallthrough
CT: control target
= control target key end

     0   :  { %s373_s6 = smov 0   ;;  %s375_s7 = smov 0   ;;  %s422_s0 = inlined_call_operand.vmem [shape: f32[2,1,3,3], index: 0, kind: input, shape index: {}]   ;;  %s423_s1 = inlined_call_operand.vmem [shape: f32[2,1,3,3], index: 1, kind: output, shape index: {}]  }
   0x1   :  { %s377_s8 = smov 0  }
   0x2 LB: > { %s299_s9 = sadd.s32 4294967295, %s360_s8   ;;  %s33_s10 = sadd.s32 1, %s356_s7  ;;  %s360_s8 = sphi %s377_s8, %s7_s8   ;;  %s356_s7 = sphi %s375_s7, %s425_s7   ;;  %s352_s6 = sphi %s373_s6, %s424_s6  }
   0x3   : > { %p35_p0 = scmp.ge.s32.totalorder %s33_s10, 2  ;;  %p301_p1 = scmp.ge.s32.totalorder %s360_s8, 2 }
   0x4   : > { %s49_s11 = sand.u32 (!%p301_p1), 1, %s360_s8   ;;  %s303_s12 = sshll.u32 (!%p301_p1), %s356_s7, 2 }
   0x5   : > { %s427_s10 = smov (%p35_p0, %s33_s10), 0  ;;  %47 = sbr.rel (%p301_p1) target bundleno = 12 (0xc), region = 16 }
   0x6   : > { %s302_s13 = sshll.u32 (!%p301_p1), %s49_s11, 2  ;;  %s56_s16 = scalar_lea.vmem (!%p301_p1), %s422_s0, %s303_s12 }
   0x7   : > { %s51_s17 = scalar_lea.vmem (!%p301_p1), [#allocation1], %s302_s13 }
   0xa   : > { %v73_v0 = vld [vmem:[%s56_s16] sm:$0xf] }
   0xb   : > { %74 = vst [vmem:[%s51_s17] sm:$0xf] %v73_v0 }
   0xc PF: > { %p304_p2 = scmp.ge.s32.totalorder %s360_s8, 1  ;;  %p91_p3 = scmp.lt.s32.totalorder %s360_s8, 3 }
   0xe   : > { %p92_p4 = pnand %p304_p2, %p91_p3 }
  0x10   : > { %95 = sbr.rel (%p92_p4) target bundleno = 437 (0x1b5), region = 50 }
  0x15   : > { %s400_s18 = sand.u32 1, %s299_s9   ;;  %v113_v1 = vlaneseq  ;;  %v362_v20 = vmov -1.0   ;;  %s308_s22 = sshll.u32 %s352_s6, 2 }
  0x16   : > { %s305_s19 = sshll.u32 %s400_s18, 2  ;;  %s206_s25 = scalar_lea.vmem %s423_s1, %s308_s22 }
  0x17   : > { %s104_s20 = scalar_lea.vmem [#allocation1], %s305_s19  ;;  %v114_v3 = vand.u32 127, %v113_v1  ;;  %v117_v4 = vshrl.u32 %v113_v1, 7  ;;  %s108_s21 = scalar_lea.vmem [#allocation3], %s305_s19 }
  0x18   : > { %v111_v2 = vld [vmem:[%s104_s20] sm:$0xf] }
  0x19   : > { %112 = vst [vmem:[#allocation0] sm:$0xf] %v111_v2  ;;  %vm119_vm0 = vcmp.eq.s32.totalorder %v117_v4, %v114_v3  ;;  %vm115_vm1 = vcmp.lt.s32.totalorder %v114_v3, 3  ;;  %vm124_vm2 = vcmp.ge.s32.totalorder %v117_v4, %v114_v3  ;;  %vm151_vm8 = vcmp.eq.s32.totalorder %v114_v3, 0 }
  0x1a   : > { %vm125_vm3 = vmand %vm124_vm2, %vm115_vm1  ;;  %vm148_vm9 = vcmp.eq.s32.totalorder %v114_v3, %v117_v4  ;;  %v152_v21 = vsel %vm151_vm8, 1.0, %v362_v20  ;;  %vm159_vm10 = vcmp.eq.s32.totalorder %v114_v3, 1  ;;  %vm169_vm11 = vcmp.eq.s32.totalorder %v114_v3, 2 }
  0x1b   : > { %v153_v22 = vsel %vm148_vm9, %v152_v21, 0.0 }
  0x20   : > { %v120_v5 = vld [vmem:[#allocation0] sm:$0xff] }
  0x21   : > { %v121_v6 = vsel %vm119_vm0, %v120_v5, 0.0  ;;  %v126_v15 = vsel %vm125_vm3, %v120_v5, 0.0 }
  0x22   : > { %122 = vadd.xlane.f32.xlu0 %v121_v6 }
  0x95   : > { %v123_v7 = vpop.xlane.xlu0 %122 }
  0x96   : > { %336 = vrcp.f32 %v123_v7  ;;  %v138_v11 = vand.u32 2147483648, %v123_v7  ;;  %v136_v13 = vand.u32 2147483647, %v123_v7  ;;  %vm132_vm5 = vweird.f32 %v123_v7 }
  0x98   : > { %v139_v16 = vor.u32 1.1754944e-38, %v138_v11  ;;  %vm137_vm7 = vcmp.eq.f32.partialorder %v136_v13, 8.507059e+37 }
  0x9c   : > { %v337_v8 = vpop.eup %336 }
  0x9d   : > { %v128_v9 = vmul.f32 %v337_v8, %v123_v7  ;;  %vm133_vm4 = vweird.f32 %v337_v8 }
  0x9e   : > { %vm134_vm6 = vmor %vm132_vm5, %vm133_vm4 }
  0x9f   : > { %v129_v10 = vsub.f32 1.0, %v128_v9 }
  0xa1   : > { %v130_v12 = vmul.f32 %v337_v8, %v129_v10 }
  0xa3   : > { %v131_v14 = vadd.f32 %v337_v8, %v130_v12 }
  0xa5   : > { %v135_v17 = vsel %vm134_vm6, %v337_v8, %v131_v14 }
  0xa6   : > { %v140_v18 = vsel %vm137_vm7, %v139_v16, %v135_v17 }
  0xa7   : > { %v141_v19 = vmul.f32 %v140_v18, %v126_v15 }
  0xa9   : > { %142 = vst [vmem:[#allocation4] sm:$0xff] %v141_v19 }
  0xb0   : > { %v155_v23 = vld [vmem:[#allocation4 + $0x1] ss:$0 sm:$0xff]  ;;  %v165_v26 = vld [vmem:[#allocation4 + $0x2] ss:$0 sm:$0xff] }
  0xb1   : > { %v156_v24 = vxor.u32 2147483648, %v155_v23  ;;  %v166_v28 = vxor.u32 2147483648, %v165_v26 }
  0xb3   : > { %v160_v25 = vmul.f32 %v156_v24, %v153_v22 }
  0xb5   : > { %161 = vadd.xlane.f32.xlu0 %v160_v25 }
 0x128   : > { %v162_v27 = vpop.xlane.xlu0 %161 }
 0x129   : > { %v163_v29 = vsel %vm159_vm10, %v162_v27, %v153_v22 }
 0x12a   : > { %v170_v30 = vmul.f32 %v166_v28, %v163_v29 }
 0x12c   : > { %171 = vadd.xlane.f32.xlu1 %v170_v30 }
 0x19f   : > { %v172_v31 = vpop.xlane.xlu1 %171 }
 0x1a0   : > { %v173_v32 = vsel %vm169_vm11, %v172_v31, %v163_v29 }
 0x1a1   : > { %v188_v33 = vmul.f32 %v173_v32, %v140_v18 }
 0x1a3   : > { %v190_v34 = vsel %vm132_vm5, %v173_v32, %v188_v33 }
 0x1a4   : > { %191 = vst [vmem:[#allocation2] sm:$0xff] %v190_v34 }
 0x1ab   : > { %v194_v35 = vld [vmem:[#allocation2] sm:$0xf] }
 0x1ac   : > { %197 = vst [vmem:[%s108_s21] sm:$0xf] %v194_v35 }
 0x1b3   : > { %v223_v36 = vld [vmem:[%s108_s21] sm:$0xf] }
 0x1b4   : > { %224 = vst [vmem:[%s206_s25] sm:$0xf] %v223_v36 }
 0x1b5 PF: > { %s7_s8 = sadd.s32 1, %s360_s8   ;;  %s424_s6 = smov %s356_s7 }
 0x1b6   : > { %p4_p5 = scmp.ge.s32.totalorder %s7_s8, 4   ;;  %s425_s7 = smov %s427_s10 }
 0x1b8   :  { %6 = sbr.rel (!%p4_p5) target bundleno = 2 (0x2), region = 112 }

// kernel: custom-call.9
= control target key start
LH: loop header
LB: loop body
LE: loop exit
PB: predicated region body
PF: predicated region fallthrough
CT: control target
= control target key end

     0   :  { %s372_s6 = smov 0   ;;  %s374_s7 = smov 0   ;;  %s421_s0 = inlined_call_operand.vmem [shape: f32[2,1,3,3], index: 0, kind: input, shape index: {}]   ;;  %s422_s1 = inlined_call_operand.vmem [shape: f32[2,1,3,3], index: 1, kind: output, shape index: {}]  }
   0x1   :  { %s376_s8 = smov 0  }
   0x2 LB: > { %s298_s9 = sadd.s32 4294967295, %s359_s8   ;;  %s33_s10 = sadd.s32 1, %s355_s7  ;;  %s359_s8 = sphi %s376_s8, %s7_s8   ;;  %s355_s7 = sphi %s374_s7, %s424_s7   ;;  %s351_s6 = sphi %s372_s6, %s423_s6  }
   0x3   : > { %p35_p0 = scmp.ge.s32.totalorder %s33_s10, 2  ;;  %p300_p1 = scmp.ge.s32.totalorder %s359_s8, 2 }
   0x4   : > { %s49_s11 = sand.u32 (!%p300_p1), 1, %s359_s8   ;;  %s302_s12 = sshll.u32 (!%p300_p1), %s355_s7, 2 }
   0x5   : > { %s426_s10 = smov (%p35_p0, %s33_s10), 0  ;;  %47 = sbr.rel (%p300_p1) target bundleno = 12 (0xc), region = 16 }
   0x6   : > { %s301_s13 = sshll.u32 (!%p300_p1), %s49_s11, 2  ;;  %s56_s16 = scalar_lea.vmem (!%p300_p1), %s421_s0, %s302_s12 }
   0x7   : > { %s51_s17 = scalar_lea.vmem (!%p300_p1), [#allocation1], %s301_s13 }
   0xa   : > { %v73_v0 = vld [vmem:[%s56_s16] sm:$0xf] }
   0xb   : > { %74 = vst [vmem:[%s51_s17] sm:$0xf] %v73_v0 }
   0xc PF: > { %p303_p2 = scmp.ge.s32.totalorder %s359_s8, 1  ;;  %p91_p3 = scmp.lt.s32.totalorder %s359_s8, 3 }
   0xe   : > { %p92_p4 = pnand %p303_p2, %p91_p3 }
  0x10   : > { %95 = sbr.rel (%p92_p4) target bundleno = 437 (0x1b5), region = 50 }
  0x15   : > { %s399_s18 = sand.u32 1, %s298_s9   ;;  %v113_v1 = vlaneseq  ;;  %v361_v20 = vmov -1.0   ;;  %s307_s22 = sshll.u32 %s351_s6, 2 }
  0x16   : > { %s304_s19 = sshll.u32 %s399_s18, 2  ;;  %s205_s25 = scalar_lea.vmem %s422_s1, %s307_s22 }
  0x17   : > { %s104_s20 = scalar_lea.vmem [#allocation1], %s304_s19  ;;  %v114_v3 = vand.u32 127, %v113_v1  ;;  %v117_v4 = vshrl.u32 %v113_v1, 7  ;;  %s108_s21 = scalar_lea.vmem [#allocation3], %s304_s19 }
  0x18   : > { %v111_v2 = vld [vmem:[%s104_s20] sm:$0xf] }
  0x19   : > { %112 = vst [vmem:[#allocation0] sm:$0xf] %v111_v2  ;;  %vm119_vm0 = vcmp.eq.s32.totalorder %v117_v4, %v114_v3  ;;  %vm115_vm1 = vcmp.lt.s32.totalorder %v114_v3, 3  ;;  %vm124_vm2 = vcmp.le.s32.totalorder %v117_v4, %v114_v3  ;;  %vm151_vm8 = vcmp.eq.s32.totalorder %v114_v3, 2 }
  0x1a   : > { %vm125_vm3 = vmand %vm124_vm2, %vm115_vm1  ;;  %vm148_vm9 = vcmp.eq.s32.totalorder %v114_v3, %v117_v4  ;;  %v152_v21 = vsel %vm151_vm8, 1.0, %v361_v20  ;;  %vm159_vm10 = vcmp.eq.s32.totalorder %v114_v3, 1  ;;  %vm168_vm11 = vcmp.eq.s32.totalorder %v114_v3, 0 }
  0x1b   : > { %v153_v22 = vsel %vm148_vm9, %v152_v21, 0.0 }
  0x20   : > { %v120_v5 = vld [vmem:[#allocation0] sm:$0xff] }
  0x21   : > { %v121_v6 = vsel %vm119_vm0, %v120_v5, 0.0  ;;  %v126_v15 = vsel %vm125_vm3, %v120_v5, 0.0 }
  0x22   : > { %122 = vadd.xlane.f32.xlu0 %v121_v6 }
  0x95   : > { %v123_v7 = vpop.xlane.xlu0 %122 }
  0x96   : > { %335 = vrcp.f32 %v123_v7  ;;  %v138_v11 = vand.u32 2147483648, %v123_v7  ;;  %v136_v13 = vand.u32 2147483647, %v123_v7  ;;  %vm132_vm5 = vweird.f32 %v123_v7 }
  0x98   : > { %v139_v16 = vor.u32 1.1754944e-38, %v138_v11  ;;  %vm137_vm7 = vcmp.eq.f32.partialorder %v136_v13, 8.507059e+37 }
  0x9c   : > { %v336_v8 = vpop.eup %335 }
  0x9d   : > { %v128_v9 = vmul.f32 %v336_v8, %v123_v7  ;;  %vm133_vm4 = vweird.f32 %v336_v8 }
  0x9e   : > { %vm134_vm6 = vmor %vm132_vm5, %vm133_vm4 }
  0x9f   : > { %v129_v10 = vsub.f32 1.0, %v128_v9 }
  0xa1   : > { %v130_v12 = vmul.f32 %v336_v8, %v129_v10 }
  0xa3   : > { %v131_v14 = vadd.f32 %v336_v8, %v130_v12 }
  0xa5   : > { %v135_v17 = vsel %vm134_vm6, %v336_v8, %v131_v14 }
  0xa6   : > { %v140_v18 = vsel %vm137_vm7, %v139_v16, %v135_v17 }
  0xa7   : > { %v141_v19 = vmul.f32 %v140_v18, %v126_v15 }
  0xa9   : > { %142 = vst [vmem:[#allocation4] sm:$0xff] %v141_v19 }
  0xb0   : > { %v155_v23 = vld [vmem:[#allocation4 + $0x1] ss:$0 sm:$0xff]  ;;  %v164_v26 = vld [vmem:[#allocation4] ss:$0 sm:$0xff] }
  0xb1   : > { %v156_v24 = vxor.u32 2147483648, %v155_v23  ;;  %v165_v28 = vxor.u32 2147483648, %v164_v26 }
  0xb3   : > { %v160_v25 = vmul.f32 %v156_v24, %v153_v22 }
  0xb5   : > { %161 = vadd.xlane.f32.xlu0 %v160_v25 }
 0x128   : > { %v162_v27 = vpop.xlane.xlu0 %161 }
 0x129   : > { %v163_v29 = vsel %vm159_vm10, %v162_v27, %v153_v22 }
 0x12a   : > { %v169_v30 = vmul.f32 %v165_v28, %v163_v29 }
 0x12c   : > { %170 = vadd.xlane.f32.xlu1 %v169_v30 }
 0x19f   : > { %v171_v31 = vpop.xlane.xlu1 %170 }
 0x1a0   : > { %v172_v32 = vsel %vm168_vm11, %v171_v31, %v163_v29 }
 0x1a1   : > { %v187_v33 = vmul.f32 %v172_v32, %v140_v18 }
 0x1a3   : > { %v189_v34 = vsel %vm132_vm5, %v172_v32, %v187_v33 }
 0x1a4   : > { %190 = vst [vmem:[#allocation2] sm:$0xff] %v189_v34 }
 0x1ab   : > { %v193_v35 = vld [vmem:[#allocation2] sm:$0xf] }
 0x1ac   : > { %196 = vst [vmem:[%s108_s21] sm:$0xf] %v193_v35 }
 0x1b3   : > { %v222_v36 = vld [vmem:[%s108_s21] sm:$0xf] }
 0x1b4   : > { %223 = vst [vmem:[%s205_s25] sm:$0xf] %v222_v36 }
 0x1b5 PF: > { %s7_s8 = sadd.s32 1, %s359_s8   ;;  %s423_s6 = smov %s355_s7 }
 0x1b6   : > { %p4_p5 = scmp.ge.s32.totalorder %s7_s8, 4   ;;  %s424_s7 = smov %s426_s10 }
 0x1b8   :  { %6 = sbr.rel (!%p4_p5) target bundleno = 2 (0x2), region = 111 }

// kernel: _lambda_.1
= control target key start
LH: loop header
LB: loop body
LE: loop exit
PB: predicated region body
PF: predicated region fallthrough
CT: control target
= control target key end

     0   :  { %7 = vsyncpa [#allocation3], 0  ;;  %s951_s9 = smov 0   ;;  %s953_s10 = smov 0   ;;  %s1268_s0 = inlined_call_operand.vmem [shape: f32[18], index: 0, kind: input, shape index: {}]   ;;  %s1269_s1 = inlined_call_operand.vmem [shape: f32[2,3,128,128], index: 1, kind: input, shape index: {}, may-alias: {1,2}]   ;;  %s1270_s2 = inlined_call_operand.vmem [shape: f32[2,3,128,128], index: 2, kind: output, shape index: {}, may-alias: {1,2}]  }
   0x1   :  { %s955_s11 = smov 0  }
   0x2 LB: > { %s753_s12 = sadd.s32 4294967295, %s933_s11   ;;  %s25_s13 = sadd.s32 1, %s929_s10  ;;  %s933_s11 = sphi %s955_s11, %s13_s11   ;;  %s929_s10 = sphi %s953_s10, %s1272_s10   ;;  %s925_s9 = sphi %s951_s9, %s1271_s9  }
   0x3   : > { %p27_p0 = scmp.ge.s32.totalorder %s25_s13, 2  ;;  %p755_p1 = scmp.ge.s32.totalorder %s933_s11, 1 }
   0x4   : > { %p107_p2 = scmp.lt.s32.totalorder %s933_s11, 3  ;;  %p865_p4 = scmp.eq.s32.totalorder %s753_s12, 0 }
   0x5   : > { %s1274_s13 = smov (%p27_p0, %s25_s13), 0  ;;  %s119_s16 = sshll.u32 %s1268_s0, 4  ;;  %s120_s16 = int_to_ptr.vmem [resolvable:$true] %s119_s16 }
   0x6   : > { %p108_p3 = pnand %p755_p1, %p107_p2  ;;  %s935_s17 = smov [#allocation2]  }
   0x8   : > { %p861_p5 = pneg %p108_p3  ;;  %145 = sbr.rel (%p108_p3) target bundleno = 184 (0xb8), region = 28 }
   0xa   : > { %p862_p6 = pnand %p865_p4, %p861_p5 }
   0xc   : > { %864 = dma.vmem_to_smem (!%p862_p6), %s120_s16, 16, %s935_s17, [#allocation3]  }
   0xd   : > { %920 = dma.done.wait (%p865_p4), [#allocation3], 16  }
   0xe   : > { %922 = vsyncadd (%p865_p4), [#allocation3], 4294967280 }
   0xf   : > { %152 = sfence }
  0x10   : > { %p178_p7 = scmp.lt.s32.totalorder %s925_s9, 1  ;;  %s973_s18 = smul.u32 9, %s925_s9 }
  0x12   : > { %s1276_s9 = smov (!%p178_p7, %s925_s9), 1  ;;  %s198_s19 = sld [smem:[#allocation2 + %s973_s18]] }
  0x13   : > { %s199_s20 = sadd.s32 1, %s973_s18  ;;  %s856_s21 = smul.u32 384, %s1276_s9 }
  0x14   : > { %s200_s22 = sld [smem:[#allocation2 + %s199_s20]]  ;;  %s201_s23 = sadd.s32 2, %s973_s18 }
  0x15   : > { %s203_s24 = sadd.s32 3, %s973_s18  ;;  %s987_s27 = scalar_lea.vmem %s1269_s1, %s856_s21 }
  0x16   : > { %s202_s28 = sld [smem:[#allocation2 + %s201_s23]]  ;;  %v215_v0 = vld [vmem:[%s987_s27] sm:$0xff]  ;;  %v216_v1 = vld [vmem:[%s987_s27 + $0x8] sm:$0xff]  ;;  %s205_s29 = sadd.s32 4, %s973_s18 }
  0x17   : > { %v762_v2 = vld [vmem:[%s987_s27 + $0x80] sm:$0xff]  ;;  %v763_v3 = vld [vmem:[%s987_s27 + $0x88] sm:$0xff]  ;;  %s204_s30 = sld [smem:[#allocation2 + %s203_s24]]  ;;  %s207_s3 = sadd.s32 5, %s973_s18 }
  0x18   : > { %v995_v4 = vstv %s198_s19  ;;  %s206_s4 = sld [smem:[#allocation2 + %s205_s29]]  ;;  %s209_s5 = sadd.s32 6, %s973_s18  ;;  %v764_v8 = vld [vmem:[%s987_s27 + $0x100] sm:$0xff]  ;;  %v765_v9 = vld [vmem:[%s987_s27 + $0x108] sm:$0xff] }
  0x19   : > { %v226_v5 = vmul.f32 %v995_v4, %v215_v0  ;;  %v227_v7 = vmul.f32 %v995_v4, %v216_v1  ;;  %s208_s6 = sld [smem:[#allocation2 + %s207_s3]]  ;;  %s211_s7 = sadd.s32 7, %s973_s18 }
  0x1a   : > { %v999_v6 = vstv %s200_s22  ;;  %s210_s8 = sld [smem:[#allocation2 + %s209_s5]]  ;;  %s213_s12 = sadd.s32 8, %s973_s18 }
  0x1b   : > { %v229_v10 = vmul.f32 %v762_v2, %v999_v6  ;;  %v230_v11 = vmul.f32 %v763_v3, %v999_v6  ;;  %s212_s14 = sld [smem:[#allocation2 + %s211_s7]]  ;;  %s1019_s19 = scalar_lea.vmem %s1270_s2, %s856_s21 }
  0x1c   : > { %v1008_v13 = vstv %s202_s28  ;;  %s214_s15 = sld [smem:[#allocation2 + %s213_s12]] }
  0x1d   : > { %v231_v12 = vadd.f32 %v229_v10, %v226_v5  ;;  %v232_v14 = vadd.f32 %v230_v11, %v227_v7  ;;  %v234_v15 = vmul.f32 %v764_v8, %v1008_v13  ;;  %v235_v16 = vmul.f32 %v765_v9, %v1008_v13 }
  0x1e   : > { %v1012_v17 = vstv %s204_s30  ;;  %v1022_v19 = vstv %s206_s4 }
  0x1f   : > { %v241_v18 = vmul.f32 %v1012_v17, %v215_v0  ;;  %v242_v20 = vmul.f32 %v1012_v17, %v216_v1  ;;  %v236_v21 = vadd.f32 %v234_v15, %v231_v12  ;;  %v237_v22 = vadd.f32 %v235_v16, %v232_v14 }
  0x20   : > { %v244_v23 = vmul.f32 %v762_v2, %v1022_v19  ;;  %v1026_v24 = vstv %s208_s6  ;;  %v245_v26 = vmul.f32 %v763_v3, %v1022_v19  ;;  %v1031_v28 = vstv %s210_s8 }
  0x21   : > { %v249_v25 = vmul.f32 %v764_v8, %v1026_v24  ;;  %v250_v27 = vmul.f32 %v765_v9, %v1026_v24  ;;  %238 = vst [vmem:[%s1019_s19] sm:$0xff] %v236_v21  ;;  %v257_v30 = vmul.f32 %v1031_v28, %v215_v0  ;;  %v1035_v31 = vstv %s212_s14 }
  0x22   : > { %v246_v29 = vadd.f32 %v244_v23, %v241_v18  ;;  %v258_v32 = vmul.f32 %v1031_v28, %v216_v1  ;;  %239 = vst [vmem:[%s1019_s19 + $0x8] sm:$0xff] %v237_v22  ;;  %v247_v33 = vadd.f32 %v245_v26, %v242_v20  ;;  %v260_v34 = vmul.f32 %v762_v2, %v1035_v31 }
  0x23   : > { %v1040_v35 = vstv %s214_s15  ;;  %v261_v36 = vmul.f32 %v763_v3, %v1035_v31 }
  0x24   : > { %v251_v37 = vadd.f32 %v249_v25, %v246_v29  ;;  %v265_v38 = vmul.f32 %v764_v8, %v1040_v35  ;;  %v266_v39 = vmul.f32 %v765_v9, %v1040_v35  ;;  %v252_v40 = vadd.f32 %v250_v27, %v247_v33 }
  0x25   : > { %v262_v41 = vadd.f32 %v260_v34, %v257_v30  ;;  %v263_v42 = vadd.f32 %v261_v36, %v258_v32 }
  0x26   : > { %766 = vst [vmem:[%s1019_s19 + $0x80] sm:$0xff] %v251_v37 }
  0x27   : > { %767 = vst [vmem:[%s1019_s19 + $0x88] sm:$0xff] %v252_v40  ;;  %v267_v43 = vadd.f32 %v265_v38, %v262_v41  ;;  %v268_v44 = vadd.f32 %v266_v39, %v263_v42 }
  0x29   : > { %768 = vst [vmem:[%s1019_s19 + $0x100] sm:$0xff] %v267_v43 }
  0x2a   : > { %769 = vst [vmem:[%s1019_s19 + $0x108] sm:$0xff] %v268_v44 }
  0x31   : > { %v770_v45 = vld [vmem:[%s987_s27 + $0x10] sm:$0xff]  ;;  %v771_v46 = vld [vmem:[%s987_s27 + $0x18] sm:$0xff] }
  0x32   : > { %v772_v47 = vld [vmem:[%s987_s27 + $0x90] sm:$0xff]  ;;  %v773_v48 = vld [vmem:[%s987_s27 + $0x98] sm:$0xff]  ;;  %v283_v51 = vmul.f32 %v770_v45, %v995_v4  ;;  %v284_v53 = vmul.f32 %v771_v46, %v995_v4  ;;  %v296_v54 = vmul.f32 %v770_v45, %v1012_v17  ;;  %v297_v60 = vmul.f32 %v771_v46, %v1012_v17 }
  0x33   : > { %v774_v49 = vld [vmem:[%s987_s27 + $0x110] sm:$0xff]  ;;  %v775_v50 = vld [vmem:[%s987_s27 + $0x118] sm:$0xff]  ;;  %v285_v52 = vmul.f32 %v772_v47, %v999_v6  ;;  %v286_v56 = vmul.f32 %v773_v48, %v999_v6  ;;  %v298_v57 = vmul.f32 %v772_v47, %v1022_v19  ;;  %v299_v61 = vmul.f32 %v773_v48, %v1022_v19 }
  0x34   : > { %v289_v55 = vmul.f32 %v774_v49, %v1008_v13  ;;  %v290_v59 = vmul.f32 %v775_v50, %v1008_v13  ;;  %v302_v0 = vmul.f32 %v774_v49, %v1026_v24  ;;  %v309_v1 = vmul.f32 %v770_v45, %v1031_v28 }
  0x35   : > { %v287_v58 = vadd.f32 %v285_v52, %v283_v51  ;;  %v288_v62 = vadd.f32 %v286_v56, %v284_v53  ;;  %v300_v63 = vadd.f32 %v298_v57, %v296_v54  ;;  %v301_v3 = vadd.f32 %v299_v61, %v297_v60 }
  0x36   : > { %v303_v5 = vmul.f32 %v775_v50, %v1026_v24  ;;  %v311_v7 = vmul.f32 %v772_v47, %v1035_v31  ;;  %v310_v10 = vmul.f32 %v771_v46, %v1031_v28  ;;  %v312_v11 = vmul.f32 %v773_v48, %v1035_v31 }
  0x37   : > { %v291_v2 = vadd.f32 %v289_v55, %v287_v58  ;;  %v292_v8 = vadd.f32 %v290_v59, %v288_v62  ;;  %v304_v9 = vadd.f32 %v302_v0, %v300_v63  ;;  %v315_v15 = vmul.f32 %v774_v49, %v1040_v35 }
  0x38   : > { %v305_v12 = vadd.f32 %v303_v5, %v301_v3  ;;  %v313_v14 = vadd.f32 %v311_v7, %v309_v1  ;;  %v314_v16 = vadd.f32 %v312_v11, %v310_v10  ;;  %v316_v18 = vmul.f32 %v775_v50, %v1040_v35 }
  0x39   : > { %776 = vst [vmem:[%s1019_s19 + $0x10] sm:$0xff] %v291_v2 }
  0x3a   : > { %777 = vst [vmem:[%s1019_s19 + $0x18] sm:$0xff] %v292_v8  ;;  %v317_v20 = vadd.f32 %v315_v15, %v313_v14  ;;  %v318_v21 = vadd.f32 %v316_v18, %v314_v16 }
  0x3b   : > { %778 = vst [vmem:[%s1019_s19 + $0x90] sm:$0xff] %v304_v9 }
  0x3c   : > { %779 = vst [vmem:[%s1019_s19 + $0x98] sm:$0xff] %v305_v12 }
  0x3d   : > { %780 = vst [vmem:[%s1019_s19 + $0x110] sm:$0xff] %v317_v20 }
  0x3e   : > { %781 = vst [vmem:[%s1019_s19 + $0x118] sm:$0xff] %v318_v21 }
  0x45   : > { %v782_v22 = vld [vmem:[%s987_s27 + $0x20] sm:$0xff]  ;;  %v783_v23 = vld [vmem:[%s987_s27 + $0x28] sm:$0xff] }
  0x46   : > { %v784_v25 = vld [vmem:[%s987_s27 + $0xa0] sm:$0xff]  ;;  %v785_v26 = vld [vmem:[%s987_s27 + $0xa8] sm:$0xff]  ;;  %v333_v30 = vmul.f32 %v782_v22, %v995_v4  ;;  %v334_v32 = vmul.f32 %v783_v23, %v995_v4  ;;  %v346_v36 = vmul.f32 %v782_v22, %v1012_v17  ;;  %v347_v37 = vmul.f32 %v783_v23, %v1012_v17 }
  0x47   : > { %v786_v27 = vld [vmem:[%s987_s27 + $0x120] sm:$0xff]  ;;  %v787_v29 = vld [vmem:[%s987_s27 + $0x128] sm:$0xff]  ;;  %v335_v33 = vmul.f32 %v784_v25, %v999_v6  ;;  %v336_v34 = vmul.f32 %v785_v26, %v999_v6  ;;  %v348_v40 = vmul.f32 %v784_v25, %v1022_v19  ;;  %v349_v41 = vmul.f32 %v785_v26, %v1022_v19 }
  0x48   : > { %v339_v38 = vmul.f32 %v786_v27, %v1008_v13  ;;  %v340_v39 = vmul.f32 %v787_v29, %v1008_v13  ;;  %v359_v42 = vmul.f32 %v782_v22, %v1031_v28  ;;  %v360_v43 = vmul.f32 %v783_v23, %v1031_v28 }
  0x49   : > { %v361_v44 = vmul.f32 %v784_v25, %v1035_v31  ;;  %v362_v45 = vmul.f32 %v785_v26, %v1035_v31  ;;  %v352_v46 = vmul.f32 %v786_v27, %v1026_v24  ;;  %v353_v47 = vmul.f32 %v787_v29, %v1026_v24 }
  0x4a   : > { %v337_v48 = vadd.f32 %v335_v33, %v333_v30  ;;  %v338_v49 = vadd.f32 %v336_v34, %v334_v32  ;;  %v350_v50 = vadd.f32 %v348_v40, %v346_v36  ;;  %v351_v51 = vadd.f32 %v349_v41, %v347_v37 }
  0x4b   : > { %v363_v52 = vadd.f32 %v361_v44, %v359_v42  ;;  %v364_v53 = vadd.f32 %v362_v45, %v360_v43  ;;  %v365_v54 = vmul.f32 %v786_v27, %v1040_v35  ;;  %v366_v57 = vmul.f32 %v787_v29, %v1040_v35 }
  0x4c   : > { %v341_v55 = vadd.f32 %v339_v38, %v337_v48  ;;  %v342_v56 = vadd.f32 %v340_v39, %v338_v49  ;;  %v354_v58 = vadd.f32 %v352_v46, %v350_v50  ;;  %v355_v59 = vadd.f32 %v353_v47, %v351_v51 }
  0x4d   : > { %v367_v60 = vadd.f32 %v365_v54, %v363_v52  ;;  %v368_v61 = vadd.f32 %v366_v57, %v364_v53 }
  0x4e   : > { %788 = vst [vmem:[%s1019_s19 + $0x20] sm:$0xff] %v341_v55 }
  0x4f   : > { %789 = vst [vmem:[%s1019_s19 + $0x28] sm:$0xff] %v342_v56 }
  0x50   : > { %790 = vst [vmem:[%s1019_s19 + $0xa0] sm:$0xff] %v354_v58 }
  0x51   : > { %791 = vst [vmem:[%s1019_s19 + $0xa8] sm:$0xff] %v355_v59 }
  0x52   : > { %792 = vst [vmem:[%s1019_s19 + $0x120] sm:$0xff] %v367_v60 }
  0x53   : > { %793 = vst [vmem:[%s1019_s19 + $0x128] sm:$0xff] %v368_v61 }
  0x5a   : > { %v794_v62 = vld [vmem:[%s987_s27 + $0x30] sm:$0xff]  ;;  %v795_v63 = vld [vmem:[%s987_s27 + $0x38] sm:$0xff] }
  0x5b   : > { %v796_v0 = vld [vmem:[%s987_s27 + $0xb0] sm:$0xff]  ;;  %v797_v1 = vld [vmem:[%s987_s27 + $0xb8] sm:$0xff]  ;;  %v383_v5 = vmul.f32 %v794_v62, %v995_v4  ;;  %v384_v7 = vmul.f32 %v795_v63, %v995_v4  ;;  %v396_v9 = vmul.f32 %v794_v62, %v1012_v17  ;;  %v397_v14 = vmul.f32 %v795_v63, %v1012_v17 }
  0x5c   : > { %v798_v2 = vld [vmem:[%s987_s27 + $0x130] sm:$0xff]  ;;  %v799_v3 = vld [vmem:[%s987_s27 + $0x138] sm:$0xff]  ;;  %v385_v8 = vmul.f32 %v796_v0, %v999_v6  ;;  %v386_v10 = vmul.f32 %v797_v1, %v999_v6  ;;  %v398_v16 = vmul.f32 %v796_v0, %v1022_v19  ;;  %v399_v18 = vmul.f32 %v797_v1, %v1022_v19 }
  0x5d   : > { %v389_v11 = vmul.f32 %v798_v2, %v1008_v13  ;;  %v390_v12 = vmul.f32 %v799_v3, %v1008_v13  ;;  %v402_v20 = vmul.f32 %v798_v2, %v1026_v24  ;;  %v403_v22 = vmul.f32 %v799_v3, %v1026_v24 }
  0x5e   : > { %v387_v15 = vadd.f32 %v385_v8, %v383_v5  ;;  %v388_v21 = vadd.f32 %v386_v10, %v384_v7  ;;  %v409_v23 = vmul.f32 %v794_v62, %v1031_v28  ;;  %v410_v25 = vmul.f32 %v795_v63, %v1031_v28 }
  0x5f   : > { %v400_v27 = vadd.f32 %v398_v16, %v396_v9  ;;  %v401_v29 = vadd.f32 %v399_v18, %v397_v14  ;;  %v411_v30 = vmul.f32 %v796_v0, %v1035_v31  ;;  %v412_v33 = vmul.f32 %v797_v1, %v1035_v31 }
  0x60   : > { %v391_v26 = vadd.f32 %v389_v11, %v387_v15  ;;  %v392_v32 = vadd.f32 %v390_v12, %v388_v21  ;;  %v415_v38 = vmul.f32 %v798_v2, %v1040_v35  ;;  %v416_v40 = vmul.f32 %v799_v3, %v1040_v35 }
  0x61   : > { %v404_v34 = vadd.f32 %v402_v20, %v400_v27  ;;  %v405_v36 = vadd.f32 %v403_v22, %v401_v29  ;;  %v413_v37 = vadd.f32 %v411_v30, %v409_v23  ;;  %v414_v39 = vadd.f32 %v412_v33, %v410_v25 }
  0x62   : > { %800 = vst [vmem:[%s1019_s19 + $0x30] sm:$0xff] %v391_v26 }
  0x63   : > { %801 = vst [vmem:[%s1019_s19 + $0x38] sm:$0xff] %v392_v32  ;;  %v417_v41 = vadd.f32 %v415_v38, %v413_v37  ;;  %v418_v42 = vadd.f32 %v416_v40, %v414_v39 }
  0x64   : > { %802 = vst [vmem:[%s1019_s19 + $0xb0] sm:$0xff] %v404_v34 }
  0x65   : > { %803 = vst [vmem:[%s1019_s19 + $0xb8] sm:$0xff] %v405_v36 }
  0x66   : > { %804 = vst [vmem:[%s1019_s19 + $0x130] sm:$0xff] %v417_v41 }
  0x67   : > { %805 = vst [vmem:[%s1019_s19 + $0x138] sm:$0xff] %v418_v42 }
  0x6e   : > { %v806_v43 = vld [vmem:[%s987_s27 + $0x40] sm:$0xff]  ;;  %v807_v44 = vld [vmem:[%s987_s27 + $0x48] sm:$0xff] }
  0x6f   : > { %v808_v45 = vld [vmem:[%s987_s27 + $0xc0] sm:$0xff]  ;;  %v809_v46 = vld [vmem:[%s987_s27 + $0xc8] sm:$0xff]  ;;  %v433_v49 = vmul.f32 %v806_v43, %v995_v4  ;;  %v434_v50 = vmul.f32 %v807_v44, %v995_v4  ;;  %v446_v52 = vmul.f32 %v806_v43, %v1012_v17  ;;  %v447_v56 = vmul.f32 %v807_v44, %v1012_v17 }
  0x70   : > { %v810_v47 = vld [vmem:[%s987_s27 + $0x140] sm:$0xff]  ;;  %v811_v48 = vld [vmem:[%s987_s27 + $0x148] sm:$0xff]  ;;  %v435_v51 = vmul.f32 %v808_v45, %v999_v6  ;;  %v436_v53 = vmul.f32 %v809_v46, %v999_v6  ;;  %v448_v58 = vmul.f32 %v808_v45, %v1022_v19  ;;  %v449_v59 = vmul.f32 %v809_v46, %v1022_v19 }
  0x71   : > { %v439_v54 = vmul.f32 %v810_v47, %v1008_v13  ;;  %v440_v55 = vmul.f32 %v811_v48, %v1008_v13  ;;  %v452_v60 = vmul.f32 %v810_v47, %v1026_v24  ;;  %v453_v62 = vmul.f32 %v811_v48, %v1026_v24 }
  0x72   : > { %v437_v57 = vadd.f32 %v435_v51, %v433_v49  ;;  %v438_v61 = vadd.f32 %v436_v53, %v434_v50  ;;  %v459_v63 = vmul.f32 %v806_v43, %v1031_v28  ;;  %v460_v0 = vmul.f32 %v807_v44, %v1031_v28 }
  0x73   : > { %v450_v2 = vadd.f32 %v448_v58, %v446_v52  ;;  %v451_v3 = vadd.f32 %v449_v59, %v447_v56  ;;  %v461_v5 = vmul.f32 %v808_v45, %v1035_v31  ;;  %v462_v8 = vmul.f32 %v809_v46, %v1035_v31 }
  0x74   : > { %v441_v1 = vadd.f32 %v439_v54, %v437_v57  ;;  %v442_v7 = vadd.f32 %v440_v55, %v438_v61  ;;  %v465_v12 = vmul.f32 %v810_v47, %v1040_v35  ;;  %v466_v15 = vmul.f32 %v811_v48, %v1040_v35 }
  0x75   : > { %v454_v9 = vadd.f32 %v452_v60, %v450_v2  ;;  %v455_v10 = vadd.f32 %v453_v62, %v451_v3  ;;  %v463_v11 = vadd.f32 %v461_v5, %v459_v63  ;;  %v464_v14 = vadd.f32 %v462_v8, %v460_v0 }
  0x76   : > { %812 = vst [vmem:[%s1019_s19 + $0x40] sm:$0xff] %v441_v1 }
  0x77   : > { %813 = vst [vmem:[%s1019_s19 + $0x48] sm:$0xff] %v442_v7  ;;  %v467_v16 = vadd.f32 %v465_v12, %v463_v11  ;;  %v468_v18 = vadd.f32 %v466_v15, %v464_v14 }
  0x78   : > { %814 = vst [vmem:[%s1019_s19 + $0xc0] sm:$0xff] %v454_v9 }
  0x79   : > { %815 = vst [vmem:[%s1019_s19 + $0xc8] sm:$0xff] %v455_v10 }
  0x7a   : > { %816 = vst [vmem:[%s1019_s19 + $0x140] sm:$0xff] %v467_v16 }
  0x7b   : > { %817 = vst [vmem:[%s1019_s19 + $0x148] sm:$0xff] %v468_v18 }
  0x82   : > { %v818_v20 = vld [vmem:[%s987_s27 + $0x50] sm:$0xff]  ;;  %v819_v21 = vld [vmem:[%s987_s27 + $0x58] sm:$0xff] }
  0x83   : > { %v820_v22 = vld [vmem:[%s987_s27 + $0xd0] sm:$0xff]  ;;  %v821_v23 = vld [vmem:[%s987_s27 + $0xd8] sm:$0xff]  ;;  %v483_v27 = vmul.f32 %v818_v20, %v995_v4  ;;  %v484_v29 = vmul.f32 %v819_v21, %v995_v4  ;;  %v496_v32 = vmul.f32 %v818_v20, %v1012_v17  ;;  %v497_v37 = vmul.f32 %v819_v21, %v1012_v17 }
  0x84   : > { %v822_v25 = vld [vmem:[%s987_s27 + $0x150] sm:$0xff]  ;;  %v823_v26 = vld [vmem:[%s987_s27 + $0x158] sm:$0xff]  ;;  %v485_v30 = vmul.f32 %v820_v22, %v999_v6  ;;  %v486_v33 = vmul.f32 %v821_v23, %v999_v6  ;;  %v498_v39 = vmul.f32 %v820_v22, %v1022_v19  ;;  %v499_v40 = vmul.f32 %v821_v23, %v1022_v19 }
  0x85   : > { %v489_v34 = vmul.f32 %v822_v25, %v1008_v13  ;;  %v490_v36 = vmul.f32 %v823_v26, %v1008_v13  ;;  %v502_v41 = vmul.f32 %v822_v25, %v1026_v24  ;;  %v503_v43 = vmul.f32 %v823_v26, %v1026_v24 }
  0x86   : > { %v487_v38 = vadd.f32 %v485_v30, %v483_v27  ;;  %v488_v42 = vadd.f32 %v486_v33, %v484_v29  ;;  %v509_v44 = vmul.f32 %v818_v20, %v1031_v28  ;;  %v510_v45 = vmul.f32 %v819_v21, %v1031_v28 }
  0x87   : > { %v500_v47 = vadd.f32 %v498_v39, %v496_v32  ;;  %v501_v48 = vadd.f32 %v499_v40, %v497_v37  ;;  %v511_v49 = vmul.f32 %v820_v22, %v1035_v31  ;;  %v512_v51 = vmul.f32 %v821_v23, %v1035_v31 }
  0x88   : > { %v491_v46 = vadd.f32 %v489_v34, %v487_v38  ;;  %v492_v50 = vadd.f32 %v490_v36, %v488_v42  ;;  %v515_v55 = vmul.f32 %v822_v25, %v1040_v35  ;;  %v516_v57 = vmul.f32 %v823_v26, %v1040_v35 }
  0x89   : > { %v504_v52 = vadd.f32 %v502_v41, %v500_v47  ;;  %v505_v53 = vadd.f32 %v503_v43, %v501_v48  ;;  %v513_v54 = vadd.f32 %v511_v49, %v509_v44  ;;  %v514_v56 = vadd.f32 %v512_v51, %v510_v45 }
  0x8a   : > { %824 = vst [vmem:[%s1019_s19 + $0x50] sm:$0xff] %v491_v46 }
  0x8b   : > { %825 = vst [vmem:[%s1019_s19 + $0x58] sm:$0xff] %v492_v50  ;;  %v517_v58 = vadd.f32 %v515_v55, %v513_v54  ;;  %v518_v59 = vadd.f32 %v516_v57, %v514_v56 }
  0x8c   : > { %826 = vst [vmem:[%s1019_s19 + $0xd0] sm:$0xff] %v504_v52 }
  0x8d   : > { %827 = vst [vmem:[%s1019_s19 + $0xd8] sm:$0xff] %v505_v53 }
  0x8e   : > { %828 = vst [vmem:[%s1019_s19 + $0x150] sm:$0xff] %v517_v58 }
  0x8f   : > { %829 = vst [vmem:[%s1019_s19 + $0x158] sm:$0xff] %v518_v59 }
  0x96   : > { %v830_v60 = vld [vmem:[%s987_s27 + $0x60] sm:$0xff]  ;;  %v831_v61 = vld [vmem:[%s987_s27 + $0x68] sm:$0xff] }
  0x97   : > { %v832_v62 = vld [vmem:[%s987_s27 + $0xe0] sm:$0xff]  ;;  %v833_v63 = vld [vmem:[%s987_s27 + $0xe8] sm:$0xff]  ;;  %v533_v2 = vmul.f32 %v830_v60, %v995_v4  ;;  %v534_v3 = vmul.f32 %v831_v61, %v995_v4  ;;  %v546_v7 = vmul.f32 %v830_v60, %v1012_v17  ;;  %v547_v11 = vmul.f32 %v831_v61, %v1012_v17 }
  0x98   : > { %v834_v0 = vld [vmem:[%s987_s27 + $0x160] sm:$0xff]  ;;  %v835_v1 = vld [vmem:[%s987_s27 + $0x168] sm:$0xff]  ;;  %v535_v5 = vmul.f32 %v832_v62, %v999_v6  ;;  %v536_v8 = vmul.f32 %v833_v63, %v999_v6  ;;  %v548_v14 = vmul.f32 %v832_v62, %v1022_v19  ;;  %v549_v15 = vmul.f32 %v833_v63, %v1022_v19 }
  0x99   : > { %v539_v9 = vmul.f32 %v834_v0, %v1008_v13  ;;  %v540_v10 = vmul.f32 %v835_v1, %v1008_v13  ;;  %v552_v16 = vmul.f32 %v834_v0, %v1026_v24  ;;  %v553_v20 = vmul.f32 %v835_v1, %v1026_v24 }
  0x9a   : > { %v537_v12 = vadd.f32 %v535_v5, %v533_v2  ;;  %v538_v18 = vadd.f32 %v536_v8, %v534_v3  ;;  %v559_v21 = vmul.f32 %v830_v60, %v1031_v28  ;;  %v560_v22 = vmul.f32 %v831_v61, %v1031_v28 }
  0x9b   : > { %v550_v25 = vadd.f32 %v548_v14, %v546_v7  ;;  %v551_v26 = vadd.f32 %v549_v15, %v547_v11  ;;  %v561_v27 = vmul.f32 %v832_v62, %v1035_v31  ;;  %v562_v30 = vmul.f32 %v833_v63, %v1035_v31 }
  0x9c   : > { %v541_v23 = vadd.f32 %v539_v9, %v537_v12  ;;  %v542_v29 = vadd.f32 %v540_v10, %v538_v18  ;;  %v565_v36 = vmul.f32 %v834_v0, %v1040_v35  ;;  %v566_v38 = vmul.f32 %v835_v1, %v1040_v35 }
  0x9d   : > { %v554_v32 = vadd.f32 %v552_v16, %v550_v25  ;;  %v555_v33 = vadd.f32 %v553_v20, %v551_v26  ;;  %v563_v34 = vadd.f32 %v561_v27, %v559_v21  ;;  %v564_v37 = vadd.f32 %v562_v30, %v560_v22 }
  0x9e   : > { %836 = vst [vmem:[%s1019_s19 + $0x60] sm:$0xff] %v541_v23 }
  0x9f   : > { %837 = vst [vmem:[%s1019_s19 + $0x68] sm:$0xff] %v542_v29  ;;  %v567_v39 = vadd.f32 %v565_v36, %v563_v34  ;;  %v568_v40 = vadd.f32 %v566_v38, %v564_v37 }
  0xa0   : > { %838 = vst [vmem:[%s1019_s19 + $0xe0] sm:$0xff] %v554_v32 }
  0xa1   : > { %839 = vst [vmem:[%s1019_s19 + $0xe8] sm:$0xff] %v555_v33 }
  0xa2   : > { %840 = vst [vmem:[%s1019_s19 + $0x160] sm:$0xff] %v567_v39 }
  0xa3   : > { %841 = vst [vmem:[%s1019_s19 + $0x168] sm:$0xff] %v568_v40 }
  0xaa   : > { %v842_v41 = vld [vmem:[%s987_s27 + $0x70] sm:$0xff]  ;;  %v843_v42 = vld [vmem:[%s987_s27 + $0x78] sm:$0xff] }
  0xab   : > { %v844_v43 = vld [vmem:[%s987_s27 + $0xf0] sm:$0xff]  ;;  %v845_v44 = vld [vmem:[%s987_s27 + $0xf8] sm:$0xff]  ;;  %v583_v47 = vmul.f32 %v842_v41, %v995_v4  ;;  %v584_v48 = vmul.f32 %v843_v42, %v995_v4  ;;  %v596_v50 = vmul.f32 %v842_v41, %v1012_v17  ;;  %v597_v54 = vmul.f32 %v843_v42, %v1012_v17 }
  0xac   : > { %v846_v45 = vld [vmem:[%s987_s27 + $0x170] sm:$0xff]  ;;  %v847_v46 = vld [vmem:[%s987_s27 + $0x178] sm:$0xff]  ;;  %v585_v49 = vmul.f32 %v844_v43, %v999_v6  ;;  %v586_v51 = vmul.f32 %v845_v44, %v999_v6  ;;  %v598_v56 = vmul.f32 %v844_v43, %v1022_v19  ;;  %v599_v57 = vmul.f32 %v845_v44, %v1022_v19 }
  0xad   : > { %v589_v52 = vmul.f32 %v846_v45, %v1008_v13  ;;  %v590_v53 = vmul.f32 %v847_v46, %v1008_v13  ;;  %v602_v4 = vmul.f32 %v846_v45, %v1026_v24  ;;  %v603_v59 = vmul.f32 %v847_v46, %v1026_v24 }
  0xae   : > { %v587_v55 = vadd.f32 %v585_v49, %v583_v47  ;;  %v588_v58 = vadd.f32 %v586_v51, %v584_v48  ;;  %v609_v6 = vmul.f32 %v842_v41, %v1031_v28  ;;  %v610_v60 = vmul.f32 %v843_v42, %v1031_v28 }
  0xaf   : > { %v600_v61 = vadd.f32 %v598_v56, %v596_v50  ;;  %v601_v17 = vadd.f32 %v599_v57, %v597_v54  ;;  %v611_v62 = vmul.f32 %v844_v43, %v1035_v31  ;;  %v612_v63 = vmul.f32 %v845_v44, %v1035_v31 }
  0xb0   : > { %v591_v13 = vadd.f32 %v589_v52, %v587_v55  ;;  %v592_v19 = vadd.f32 %v590_v53, %v588_v58  ;;  %v615_v2 = vmul.f32 %v846_v45, %v1040_v35  ;;  %v616_v28 = vmul.f32 %v847_v46, %v1040_v35 }
  0xb1   : > { %v604_v0 = vadd.f32 %v602_v4, %v600_v61  ;;  %v605_v1 = vadd.f32 %v603_v59, %v601_v17  ;;  %v613_v24 = vadd.f32 %v611_v62, %v609_v6  ;;  %v614_v3 = vadd.f32 %v612_v63, %v610_v60 }
  0xb2   : > { %848 = vst [vmem:[%s1019_s19 + $0x70] sm:$0xff] %v591_v13 }
  0xb3   : > { %849 = vst [vmem:[%s1019_s19 + $0x78] sm:$0xff] %v592_v19  ;;  %v617_v5 = vadd.f32 %v615_v2, %v613_v24  ;;  %v618_v7 = vadd.f32 %v616_v28, %v614_v3 }
  0xb4   : > { %850 = vst [vmem:[%s1019_s19 + $0xf0] sm:$0xff] %v604_v0 }
  0xb5   : > { %851 = vst [vmem:[%s1019_s19 + $0xf8] sm:$0xff] %v605_v1 }
  0xb6   : > { %852 = vst [vmem:[%s1019_s19 + $0x170] sm:$0xff] %v617_v5 }
  0xb7   : > { %853 = vst [vmem:[%s1019_s19 + $0x178] sm:$0xff] %v618_v7 }
  0xb8 PF: > { %s13_s11 = sadd.s32 1, %s933_s11   ;;  %s1271_s9 = smov %s929_s10 }
  0xb9   : > { %p10_p8 = scmp.ge.s32.totalorder %s13_s11, 4   ;;  %s1272_s10 = smov %s1274_s13 }
  0xbb   :  { %12 = sbr.rel (!%p10_p8) target bundleno = 2 (0x2), region = 109 }
  0xc0   :  { %652 = vsyncpa [#allocation3], 1 }
  0xc1   :  { %654 = vsyncpa [#allocation3 + $0x1], 1 }

</bundles_post_ra>
